<compile_context>
chip_gen: v5e
topology: v5e:2x2
jax: 0.10.0
libtpu: 0.0.40
codegen_flags: <defaults>
</compile_context>

<pallas_src>
import jax
import jax.numpy as jnp
from jax.experimental import pallas as pl
from jax.experimental.pallas import tpu as pltpu

MAX_CART_FORCE = 10.0

# ---------------------------------------------------------------------------
# Packed-parameter layout: one (48, 128) f32 buffer (24 KiB).  Everything
# lives in spare lanes of the 48-row W2 block, so the kernel issues exactly
# ONE weight DMA and slices it with cheap static ref views.
#   lanes  0:24, rows 0:48 -> W2  (48, 24)  out x in  (torch layout)
#   lane     24, rows 0:48 -> b2  (48, 1)
#   lane     25, rows 0:48 -> w3  (48, 1)   (torch (1,48) transposed)
#   lane     26, row  0    -> b3  (1, 1)
#   lanes 32:36, rows 0:24 -> W1  (24, 4)   out x in  (torch layout)
#   lane     36, rows 0:24 -> b1  (24, 1)
# ---------------------------------------------------------------------------
PACK_ROWS = 48
PACK_LANES = 128
B2_L = 24
W3_L = 25
B3_L = 26
W1_L = 32
B1_L = 36

ENV_TILE = 128   # environments per grid step: one full 128-lane row


def controller_kernel(x_ref, p_ref, o_ref):
    """MLP tile kernel: (4, B) states -> (1, B) forces, batch on lanes.

    Pure VPU/XLU/EUP: layers 1-2 are column x row broadcast FMAs, layer 3 is
    one sublane reduce; no MXU.
    """
    x = x_ref[...]                                        # (4, B)

    # --- Layer 1: Linear(4, 24) -> h1 (24, B) as 4 broadcast FMAs. ---
    w1 = p_ref[0:24, W1_L:W1_L + 4]                       # (24, 4)
    b1 = p_ref[0:24, B1_L:B1_L + 1]                       # (24, 1)
    h1 = (w1[:, 0:1] * x[0:1, :] + w1[:, 1:2] * x[1:2, :]
          + w1[:, 2:3] * x[2:3, :] + w1[:, 3:4] * x[3:4, :] + b1)
    h1 = jnp.maximum(h1, 0.0)                             # (24, B)

    # --- Layer 2: Linear(24, 48) -> h2 (48, B) as 24 broadcast FMAs. ---
    w2 = p_ref[0:48, 0:24]                                # (48, 24)
    b2 = p_ref[0:48, B2_L:B2_L + 1]                       # (48, 1)
    h2 = b2 + w2[:, 0:1] * h1[0:1, :]
    for k in range(1, 24):                                # unrolled at trace time
        h2 = h2 + w2[:, k:k + 1] * h1[k:k + 1, :]
    h2 = jnp.maximum(h2, 0.0)                             # (48, B)

    # --- Layer 3: Linear(48, 1) -> z (1, B) via one sublane reduce. ---
    w3 = p_ref[0:48, W3_L:W3_L + 1]                       # (48, 1)
    b3 = p_ref[0:1, B3_L:B3_L + 1]                        # (1, 1)
    z = jnp.sum(h2 * w3, axis=0, keepdims=True) + b3      # (1, B)
    o_ref[...] = MAX_CART_FORCE * jnp.tanh(z)


@jax.jit
def controller_forward(packed_params, xx, xt, vx, vt, ax, at):
    """Single-step forward matching the PyTorch module's contract exactly."""
    del ax, at  # unused by the PyTorch module's forward as well
    x = jnp.stack((xx, xt, vx, vt)).astype(jnp.float32).reshape(4, 1)
    out = pl.pallas_call(
        controller_kernel,
        out_shape=jax.ShapeDtypeStruct((1, 1), jnp.float32),
        in_specs=[
            pl.BlockSpec(memory_space=pltpu.MemorySpace.VMEM),   # state (4,1)
            pl.BlockSpec(memory_space=pltpu.MemorySpace.VMEM),   # packed weights
        ],
        out_specs=pl.BlockSpec(memory_space=pltpu.MemorySpace.VMEM),
    )(x, packed_params)
    return out[0, 0]


@jax.jit
def controller_forward_batched(packed_params, states):
    """Evaluate the controller for B environments inside ONE pallas_call.

    states: (4, B) f32 with rows (xx, xt, vx, vt).  Returns (B,) forces.
    The packed weights are DMA'd once and stay resident across the grid
    (constant index_map); the env axis is "parallel" so v7x's second
    TensorCore picks up half the tiles (no-op on v5e/v6e).
    """
    b = states.shape[1]
    pad = (-b) % ENV_TILE                                  # static (shape-based)
    if pad:
        states = jnp.pad(states, ((0, 0), (0, pad)))
    bp = states.shape[1]
    out = pl.pallas_call(
        controller_kernel,
        out_shape=jax.ShapeDtypeStruct((1, bp), jnp.float32),
        grid=(bp // ENV_TILE,),
        in_specs=[
            pl.BlockSpec((4, ENV_TILE), lambda i: (0, i)),             # state tile
            pl.BlockSpec((PACK_ROWS, PACK_LANES), lambda i: (0, 0)),   # resident
        ],
        out_specs=pl.BlockSpec((1, ENV_TILE), lambda i: (0, i)),
        compiler_params=pltpu.CompilerParams(
            dimension_semantics=("parallel",)),
    )(states, packed_params)
    return out[0, :b]


def init_params(key):
    """nn.Linear-style init, PyTorch layouts: W (out,in), b (out,)."""
    def linear(key, fan_in, fan_out):
        kw, kb = jax.random.split(key)
        bound = 1.0 / jnp.sqrt(jnp.float32(fan_in))
        w = jax.random.uniform(kw, (fan_out, fan_in), jnp.float32,
                               minval=-bound, maxval=bound)
        b = jax.random.uniform(kb, (fan_out,), jnp.float32,
                               minval=-bound, maxval=bound)
        return w, b

    k1, k2, k3 = jax.random.split(key, 3)
    w1, b1 = linear(k1, 4, 24)
    w2, b2 = linear(k2, 24, 48)
    w3, b3 = linear(k3, 48, 1)
    return (w1, b1, w2, b2, w3, b3)


def pack_params(params):
    """One-time packing of all weights/biases into a single 24 KiB buffer."""
    w1, b1, w2, b2, w3, b3 = params
    p = jnp.zeros((PACK_ROWS, PACK_LANES), jnp.float32)
    p = p.at[0:48, 0:24].set(w2)                        # (48, 24) out x in
    p = p.at[0:48, B2_L:B2_L + 1].set(b2[:, None])      # (48, 1)
    p = p.at[0:48, W3_L:W3_L + 1].set(w3.T)             # (48, 1)
    p = p.at[0:1, B3_L:B3_L + 1].set(b3[:, None])       # (1, 1)
    p = p.at[0:24, W1_L:W1_L + 4].set(w1)               # (24, 4) out x in
    p = p.at[0:24, B1_L:B1_L + 1].set(b1[:, None])      # (24, 1)
    return p


def controller_reference(params, xx, xt, vx, vt, ax, at):
    """Pure-JAX reference of the PyTorch forward for validation."""
    del ax, at
    w1, b1, w2, b2, w3, b3 = params
    x = jnp.stack((xx, xt, vx, vt)).astype(jnp.float32)        # (4,)
    h1 = jnp.maximum(w1 @ x + b1, 0.0)                         # (24,)
    h2 = jnp.maximum(w2 @ h1 + b2, 0.0)                        # (48,)
    y = jnp.tanh(w3 @ h2 + b3)                                 # (1,)
    return MAX_CART_FORCE * y[0]


if __name__ == "__main__":
    key = jax.random.PRNGKey(0)
    k_state, k_batch, k_params = jax.random.split(key, 3)

    params = init_params(k_params)
    packed = pack_params(params)          # packed once, reused every call

    # --- Single-step path (the PyTorch module's forward contract). ---
    xx, xt, vx, vt, ax, at = jax.random.normal(k_state, (6,), jnp.float32)
    force = jax.block_until_ready(
        controller_forward(packed, xx, xt, vx, vt, ax, at))
    ref = controller_reference(params, xx, xt, vx, vt, ax, at)
    assert jnp.allclose(force, ref, atol=1e-5, rtol=1e-5), (force, ref)

    # --- Batched path: 256 environments in one pallas_call (2 lane tiles). ---
    B = 256
    states = jax.random.normal(k_batch, (4, B), jnp.float32)
    forces = jax.block_until_ready(controller_forward_batched(packed, states))
    refs = jax.vmap(
        lambda s: controller_reference(params, s[0], s[1], s[2], s[3], 0.0, 0.0)
    )(states.T)
    assert forces.shape == (B,)
    assert jnp.allclose(forces, refs, atol=1e-4, rtol=1e-4), (forces, refs)

    print("KERNEL_OK")
</pallas_src>

<mosaic_0001>
module attributes {stable_mosaic.version = 11 : i64} {
  func.func @controller_kernel(%arg0: memref<4x1xf32, #tpu.memory_space<vmem>>, %arg1: memref<48x128xf32, #tpu.memory_space<vmem>>, %arg2: memref<1x1xf32, #tpu.memory_space<vmem>>) attributes {dimension_semantics = [], scalar_prefetch = 0 : i64, scratch_operands = 0 : i64, tpu.core_type = #tpu.core_type<tc>} {
    %c0 = arith.constant 0 : index
    %c0_0 = arith.constant 0 : index
    %0 = vector.load %arg0[%c0, %c0_0] : memref<4x1xf32, #tpu.memory_space<vmem>>, vector<4x1xf32>
    %c0_1 = arith.constant 0 : index
    %c32 = arith.constant 32 : index
    %1 = vector.load %arg1[%c0_1, %c32] : memref<48x128xf32, #tpu.memory_space<vmem>>, vector<24x4xf32>
    %c0_2 = arith.constant 0 : index
    %c36 = arith.constant 36 : index
    %2 = vector.load %arg1[%c0_2, %c36] : memref<48x128xf32, #tpu.memory_space<vmem>>, vector<24x1xf32>
    %3 = vector.extract_strided_slice %1 {offsets = [0, 0], sizes = [24, 1], strides = [1, 1]} : vector<24x4xf32> to vector<24x1xf32>
    %4 = vector.extract_strided_slice %0 {offsets = [0, 0], sizes = [1, 1], strides = [1, 1]} : vector<4x1xf32> to vector<1x1xf32>
    %5 = vector.broadcast %4 : vector<1x1xf32> to vector<24x1xf32>
    %6 = arith.mulf %3, %5 : vector<24x1xf32>
    %7 = vector.extract_strided_slice %1 {offsets = [0, 1], sizes = [24, 1], strides = [1, 1]} : vector<24x4xf32> to vector<24x1xf32>
    %8 = vector.extract_strided_slice %0 {offsets = [1, 0], sizes = [1, 1], strides = [1, 1]} : vector<4x1xf32> to vector<1x1xf32>
    %9 = vector.broadcast %8 : vector<1x1xf32> to vector<24x1xf32>
    %10 = arith.mulf %7, %9 : vector<24x1xf32>
    %11 = arith.addf %6, %10 : vector<24x1xf32>
    %12 = vector.extract_strided_slice %1 {offsets = [0, 2], sizes = [24, 1], strides = [1, 1]} : vector<24x4xf32> to vector<24x1xf32>
    %13 = vector.extract_strided_slice %0 {offsets = [2, 0], sizes = [1, 1], strides = [1, 1]} : vector<4x1xf32> to vector<1x1xf32>
    %14 = vector.broadcast %13 : vector<1x1xf32> to vector<24x1xf32>
    %15 = arith.mulf %12, %14 : vector<24x1xf32>
    %16 = arith.addf %11, %15 : vector<24x1xf32>
    %17 = vector.extract_strided_slice %1 {offsets = [0, 3], sizes = [24, 1], strides = [1, 1]} : vector<24x4xf32> to vector<24x1xf32>
    %18 = vector.extract_strided_slice %0 {offsets = [3, 0], sizes = [1, 1], strides = [1, 1]} : vector<4x1xf32> to vector<1x1xf32>
    %19 = vector.broadcast %18 : vector<1x1xf32> to vector<24x1xf32>
    %20 = arith.mulf %17, %19 : vector<24x1xf32>
    %21 = arith.addf %16, %20 : vector<24x1xf32>
    %22 = arith.addf %21, %2 : vector<24x1xf32>
    %cst = arith.constant 0.000000e+00 : f32
    %23 = vector.broadcast %cst : f32 to vector<24x1xf32>
    %24 = arith.maximumf %22, %23 : vector<24x1xf32>
    %c0_3 = arith.constant 0 : index
    %c0_4 = arith.constant 0 : index
    %25 = vector.load %arg1[%c0_3, %c0_4] : memref<48x128xf32, #tpu.memory_space<vmem>>, vector<48x24xf32>
    %c0_5 = arith.constant 0 : index
    %c24 = arith.constant 24 : index
    %26 = vector.load %arg1[%c0_5, %c24] : memref<48x128xf32, #tpu.memory_space<vmem>>, vector<48x1xf32>
    %27 = vector.extract_strided_slice %25 {offsets = [0, 0], sizes = [48, 1], strides = [1, 1]} : vector<48x24xf32> to vector<48x1xf32>
    %28 = vector.extract_strided_slice %24 {offsets = [0, 0], sizes = [1, 1], strides = [1, 1]} : vector<24x1xf32> to vector<1x1xf32>
    %29 = vector.broadcast %28 : vector<1x1xf32> to vector<48x1xf32>
    %30 = arith.mulf %27, %29 : vector<48x1xf32>
    %31 = arith.addf %26, %30 : vector<48x1xf32>
    %32 = vector.extract_strided_slice %25 {offsets = [0, 1], sizes = [48, 1], strides = [1, 1]} : vector<48x24xf32> to vector<48x1xf32>
    %33 = vector.extract_strided_slice %24 {offsets = [1, 0], sizes = [1, 1], strides = [1, 1]} : vector<24x1xf32> to vector<1x1xf32>
    %34 = vector.broadcast %33 : vector<1x1xf32> to vector<48x1xf32>
    %35 = arith.mulf %32, %34 : vector<48x1xf32>
    %36 = arith.addf %31, %35 : vector<48x1xf32>
    %37 = vector.extract_strided_slice %25 {offsets = [0, 2], sizes = [48, 1], strides = [1, 1]} : vector<48x24xf32> to vector<48x1xf32>
    %38 = vector.extract_strided_slice %24 {offsets = [2, 0], sizes = [1, 1], strides = [1, 1]} : vector<24x1xf32> to vector<1x1xf32>
    %39 = vector.broadcast %38 : vector<1x1xf32> to vector<48x1xf32>
    %40 = arith.mulf %37, %39 : vector<48x1xf32>
    %41 = arith.addf %36, %40 : vector<48x1xf32>
    %42 = vector.extract_strided_slice %25 {offsets = [0, 3], sizes = [48, 1], strides = [1, 1]} : vector<48x24xf32> to vector<48x1xf32>
    %43 = vector.extract_strided_slice %24 {offsets = [3, 0], sizes = [1, 1], strides = [1, 1]} : vector<24x1xf32> to vector<1x1xf32>
    %44 = vector.broadcast %43 : vector<1x1xf32> to vector<48x1xf32>
    %45 = arith.mulf %42, %44 : vector<48x1xf32>
    %46 = arith.addf %41, %45 : vector<48x1xf32>
    %47 = vector.extract_strided_slice %25 {offsets = [0, 4], sizes = [48, 1], strides = [1, 1]} : vector<48x24xf32> to vector<48x1xf32>
    %48 = vector.extract_strided_slice %24 {offsets = [4, 0], sizes = [1, 1], strides = [1, 1]} : vector<24x1xf32> to vector<1x1xf32>
    %49 = vector.broadcast %48 : vector<1x1xf32> to vector<48x1xf32>
    %50 = arith.mulf %47, %49 : vector<48x1xf32>
    %51 = arith.addf %46, %50 : vector<48x1xf32>
    %52 = vector.extract_strided_slice %25 {offsets = [0, 5], sizes = [48, 1], strides = [1, 1]} : vector<48x24xf32> to vector<48x1xf32>
    %53 = vector.extract_strided_slice %24 {offsets = [5, 0], sizes = [1, 1], strides = [1, 1]} : vector<24x1xf32> to vector<1x1xf32>
    %54 = vector.broadcast %53 : vector<1x1xf32> to vector<48x1xf32>
    %55 = arith.mulf %52, %54 : vector<48x1xf32>
    %56 = arith.addf %51, %55 : vector<48x1xf32>
    %57 = vector.extract_strided_slice %25 {offsets = [0, 6], sizes = [48, 1], strides = [1, 1]} : vector<48x24xf32> to vector<48x1xf32>
    %58 = vector.extract_strided_slice %24 {offsets = [6, 0], sizes = [1, 1], strides = [1, 1]} : vector<24x1xf32> to vector<1x1xf32>
    %59 = vector.broadcast %58 : vector<1x1xf32> to vector<48x1xf32>
    %60 = arith.mulf %57, %59 : vector<48x1xf32>
    %61 = arith.addf %56, %60 : vector<48x1xf32>
    %62 = vector.extract_strided_slice %25 {offsets = [0, 7], sizes = [48, 1], strides = [1, 1]} : vector<48x24xf32> to vector<48x1xf32>
    %63 = vector.extract_strided_slice %24 {offsets = [7, 0], sizes = [1, 1], strides = [1, 1]} : vector<24x1xf32> to vector<1x1xf32>
    %64 = vector.broadcast %63 : vector<1x1xf32> to vector<48x1xf32>
    %65 = arith.mulf %62, %64 : vector<48x1xf32>
    %66 = arith.addf %61, %65 : vector<48x1xf32>
    %67 = vector.extract_strided_slice %25 {offsets = [0, 8], sizes = [48, 1], strides = [1, 1]} : vector<48x24xf32> to vector<48x1xf32>
    %68 = vector.extract_strided_slice %24 {offsets = [8, 0], sizes = [1, 1], strides = [1, 1]} : vector<24x1xf32> to vector<1x1xf32>
    %69 = vector.broadcast %68 : vector<1x1xf32> to vector<48x1xf32>
    %70 = arith.mulf %67, %69 : vector<48x1xf32>
    %71 = arith.addf %66, %70 : vector<48x1xf32>
    %72 = vector.extract_strided_slice %25 {offsets = [0, 9], sizes = [48, 1], strides = [1, 1]} : vector<48x24xf32> to vector<48x1xf32>
    %73 = vector.extract_strided_slice %24 {offsets = [9, 0], sizes = [1, 1], strides = [1, 1]} : vector<24x1xf32> to vector<1x1xf32>
    %74 = vector.broadcast %73 : vector<1x1xf32> to vector<48x1xf32>
    %75 = arith.mulf %72, %74 : vector<48x1xf32>
    %76 = arith.addf %71, %75 : vector<48x1xf32>
    %77 = vector.extract_strided_slice %25 {offsets = [0, 10], sizes = [48, 1], strides = [1, 1]} : vector<48x24xf32> to vector<48x1xf32>
    %78 = vector.extract_strided_slice %24 {offsets = [10, 0], sizes = [1, 1], strides = [1, 1]} : vector<24x1xf32> to vector<1x1xf32>
    %79 = vector.broadcast %78 : vector<1x1xf32> to vector<48x1xf32>
    %80 = arith.mulf %77, %79 : vector<48x1xf32>
    %81 = arith.addf %76, %80 : vector<48x1xf32>
    %82 = vector.extract_strided_slice %25 {offsets = [0, 11], sizes = [48, 1], strides = [1, 1]} : vector<48x24xf32> to vector<48x1xf32>
    %83 = vector.extract_strided_slice %24 {offsets = [11, 0], sizes = [1, 1], strides = [1, 1]} : vector<24x1xf32> to vector<1x1xf32>
    %84 = vector.broadcast %83 : vector<1x1xf32> to vector<48x1xf32>
    %85 = arith.mulf %82, %84 : vector<48x1xf32>
    %86 = arith.addf %81, %85 : vector<48x1xf32>
    %87 = vector.extract_strided_slice %25 {offsets = [0, 12], sizes = [48, 1], strides = [1, 1]} : vector<48x24xf32> to vector<48x1xf32>
    %88 = vector.extract_strided_slice %24 {offsets = [12, 0], sizes = [1, 1], strides = [1, 1]} : vector<24x1xf32> to vector<1x1xf32>
    %89 = vector.broadcast %88 : vector<1x1xf32> to vector<48x1xf32>
    %90 = arith.mulf %87, %89 : vector<48x1xf32>
    %91 = arith.addf %86, %90 : vector<48x1xf32>
    %92 = vector.extract_strided_slice %25 {offsets = [0, 13], sizes = [48, 1], strides = [1, 1]} : vector<48x24xf32> to vector<48x1xf32>
    %93 = vector.extract_strided_slice %24 {offsets = [13, 0], sizes = [1, 1], strides = [1, 1]} : vector<24x1xf32> to vector<1x1xf32>
    %94 = vector.broadcast %93 : vector<1x1xf32> to vector<48x1xf32>
    %95 = arith.mulf %92, %94 : vector<48x1xf32>
    %96 = arith.addf %91, %95 : vector<48x1xf32>
    %97 = vector.extract_strided_slice %25 {offsets = [0, 14], sizes = [48, 1], strides = [1, 1]} : vector<48x24xf32> to vector<48x1xf32>
    %98 = vector.extract_strided_slice %24 {offsets = [14, 0], sizes = [1, 1], strides = [1, 1]} : vector<24x1xf32> to vector<1x1xf32>
    %99 = vector.broadcast %98 : vector<1x1xf32> to vector<48x1xf32>
    %100 = arith.mulf %97, %99 : vector<48x1xf32>
    %101 = arith.addf %96, %100 : vector<48x1xf32>
    %102 = vector.extract_strided_slice %25 {offsets = [0, 15], sizes = [48, 1], strides = [1, 1]} : vector<48x24xf32> to vector<48x1xf32>
    %103 = vector.extract_strided_slice %24 {offsets = [15, 0], sizes = [1, 1], strides = [1, 1]} : vector<24x1xf32> to vector<1x1xf32>
    %104 = vector.broadcast %103 : vector<1x1xf32> to vector<48x1xf32>
    %105 = arith.mulf %102, %104 : vector<48x1xf32>
    %106 = arith.addf %101, %105 : vector<48x1xf32>
    %107 = vector.extract_strided_slice %25 {offsets = [0, 16], sizes = [48, 1], strides = [1, 1]} : vector<48x24xf32> to vector<48x1xf32>
    %108 = vector.extract_strided_slice %24 {offsets = [16, 0], sizes = [1, 1], strides = [1, 1]} : vector<24x1xf32> to vector<1x1xf32>
    %109 = vector.broadcast %108 : vector<1x1xf32> to vector<48x1xf32>
    %110 = arith.mulf %107, %109 : vector<48x1xf32>
    %111 = arith.addf %106, %110 : vector<48x1xf32>
    %112 = vector.extract_strided_slice %25 {offsets = [0, 17], sizes = [48, 1], strides = [1, 1]} : vector<48x24xf32> to vector<48x1xf32>
    %113 = vector.extract_strided_slice %24 {offsets = [17, 0], sizes = [1, 1], strides = [1, 1]} : vector<24x1xf32> to vector<1x1xf32>
    %114 = vector.broadcast %113 : vector<1x1xf32> to vector<48x1xf32>
    %115 = arith.mulf %112, %114 : vector<48x1xf32>
    %116 = arith.addf %111, %115 : vector<48x1xf32>
    %117 = vector.extract_strided_slice %25 {offsets = [0, 18], sizes = [48, 1], strides = [1, 1]} : vector<48x24xf32> to vector<48x1xf32>
    %118 = vector.extract_strided_slice %24 {offsets = [18, 0], sizes = [1, 1], strides = [1, 1]} : vector<24x1xf32> to vector<1x1xf32>
    %119 = vector.broadcast %118 : vector<1x1xf32> to vector<48x1xf32>
    %120 = arith.mulf %117, %119 : vector<48x1xf32>
    %121 = arith.addf %116, %120 : vector<48x1xf32>
    %122 = vector.extract_strided_slice %25 {offsets = [0, 19], sizes = [48, 1], strides = [1, 1]} : vector<48x24xf32> to vector<48x1xf32>
    %123 = vector.extract_strided_slice %24 {offsets = [19, 0], sizes = [1, 1], strides = [1, 1]} : vector<24x1xf32> to vector<1x1xf32>
    %124 = vector.broadcast %123 : vector<1x1xf32> to vector<48x1xf32>
    %125 = arith.mulf %122, %124 : vector<48x1xf32>
    %126 = arith.addf %121, %125 : vector<48x1xf32>
    %127 = vector.extract_strided_slice %25 {offsets = [0, 20], sizes = [48, 1], strides = [1, 1]} : vector<48x24xf32> to vector<48x1xf32>
    %128 = vector.extract_strided_slice %24 {offsets = [20, 0], sizes = [1, 1], strides = [1, 1]} : vector<24x1xf32> to vector<1x1xf32>
    %129 = vector.broadcast %128 : vector<1x1xf32> to vector<48x1xf32>
    %130 = arith.mulf %127, %129 : vector<48x1xf32>
    %131 = arith.addf %126, %130 : vector<48x1xf32>
    %132 = vector.extract_strided_slice %25 {offsets = [0, 21], sizes = [48, 1], strides = [1, 1]} : vector<48x24xf32> to vector<48x1xf32>
    %133 = vector.extract_strided_slice %24 {offsets = [21, 0], sizes = [1, 1], strides = [1, 1]} : vector<24x1xf32> to vector<1x1xf32>
    %134 = vector.broadcast %133 : vector<1x1xf32> to vector<48x1xf32>
    %135 = arith.mulf %132, %134 : vector<48x1xf32>
    %136 = arith.addf %131, %135 : vector<48x1xf32>
    %137 = vector.extract_strided_slice %25 {offsets = [0, 22], sizes = [48, 1], strides = [1, 1]} : vector<48x24xf32> to vector<48x1xf32>
    %138 = vector.extract_strided_slice %24 {offsets = [22, 0], sizes = [1, 1], strides = [1, 1]} : vector<24x1xf32> to vector<1x1xf32>
    %139 = vector.broadcast %138 : vector<1x1xf32> to vector<48x1xf32>
    %140 = arith.mulf %137, %139 : vector<48x1xf32>
    %141 = arith.addf %136, %140 : vector<48x1xf32>
    %142 = vector.extract_strided_slice %25 {offsets = [0, 23], sizes = [48, 1], strides = [1, 1]} : vector<48x24xf32> to vector<48x1xf32>
    %143 = vector.extract_strided_slice %24 {offsets = [23, 0], sizes = [1, 1], strides = [1, 1]} : vector<24x1xf32> to vector<1x1xf32>
    %144 = vector.broadcast %143 : vector<1x1xf32> to vector<48x1xf32>
    %145 = arith.mulf %142, %144 : vector<48x1xf32>
    %146 = arith.addf %141, %145 : vector<48x1xf32>
    %cst_6 = arith.constant 0.000000e+00 : f32
    %147 = vector.broadcast %cst_6 : f32 to vector<48x1xf32>
    %148 = arith.maximumf %146, %147 : vector<48x1xf32>
    %c0_7 = arith.constant 0 : index
    %c25 = arith.constant 25 : index
    %149 = vector.load %arg1[%c0_7, %c25] : memref<48x128xf32, #tpu.memory_space<vmem>>, vector<48x1xf32>
    %c0_8 = arith.constant 0 : index
    %c26 = arith.constant 26 : index
    %150 = vector.load %arg1[%c0_8, %c26] : memref<48x128xf32, #tpu.memory_space<vmem>>, vector<1x1xf32>
    %151 = arith.mulf %148, %149 : vector<48x1xf32>
    %cst_9 = arith.constant dense<0.000000e+00> : vector<1xf32>
    %152 = vector.multi_reduction <add>, %151, %cst_9 [0] : vector<48x1xf32> to vector<1xf32>
    %153 = vector.shape_cast %152 : vector<1xf32> to vector<1x1xf32>
    %154 = arith.addf %153, %150 : vector<1x1xf32>
    %155 = math.tanh %154 : vector<1x1xf32>
    %cst_10 = arith.constant 1.000000e+01 : f32
    %156 = vector.broadcast %cst_10 : f32 to vector<1x1xf32>
    %157 = arith.mulf %156, %155 : vector<1x1xf32>
    %c0_11 = arith.constant 0 : index
    %c0_12 = arith.constant 0 : index
    %158 = vector.load %arg2[%c0_11, %c0_12] : memref<1x1xf32, #tpu.memory_space<vmem>>, vector<1x1xf32>
    tpu.vector_store %arg2[%c0_11, %c0_12], %157 {strides = array<i32>} : memref<1x1xf32, #tpu.memory_space<vmem>>, vector<1x1xf32>,
    return
  }
}

</mosaic_0001>

<bundles_post_ra>
// kernel: controller_forward.1
= control target key start
LH: loop header
LB: loop body
LE: loop exit
PB: predicated region body
PF: predicated region fallthrough
CT: control target
= control target key end

     0   :  { %7 = vsyncpa [#allocation3], 0  ;;  %s1801_s0 = inlined_call_operand.vmem [shape: f32[4,1], index: 0, kind: input, shape index: {}]   ;;  %s1802_s1 = inlined_call_operand.hbm [shape: f32[48,128], index: 1, kind: input, shape index: {}]   ;;  %s1803_s2 = inlined_call_operand.hbm [shape: f32[1,1], index: 2, kind: output, shape index: {}]  }
   0x1   :  { %8 = vsyncpa [#allocation4], 0  ;;  %s15_s11 = sshll.u32 %s1802_s1, 4  ;;  %s1321_s12 = smov [#allocation2]   ;;  %s16_s11 = int_to_ptr.hbm [resolvable:$true] %s15_s11 }
   0x2   :  { %s17_s13 = sshll.u32 %s1321_s12, 4  ;;  %s1322_s14 = smov 128   ;;  %s18_s13 = int_to_ptr.vmem [resolvable:$true] %s17_s13 }
   0x3   :  { %s1323_s15 = smov 8  }
   0x4   :  { %23 = dma.hbm_to_vmem [thread:$0]  %s16_s11, 768, %s18_s13, [#allocation3], %s1322_s14, %s1322_s14, %s1323_s15  }
   0x5   :  { %1317 = dma.done.wait [#allocation3], 768  }
   0x6   :  { %1318 = vsyncadd [#allocation3], 4294966528  ;;  %v28_v0 = vld [vmem:[%s1801_s0] sm:$0xf]  ;;  %s1324_s18 = smov 32   ;;  %s1325_s19 = smov 34  }
   0x7   :  { %v32_v1 = vperm.slane %v28_v0, 0  ;;  %v63_v2 = vperm.slane %v28_v0, 2  ;;  %v40_v3 = vperm.slane %v28_v0, 1  ;;  %s1326_s1 = smov 33   ;;  %v86_v4 = vperm.slane %v28_v0, 3  ;;  %s1327_s20 = smov 35  }
   0x8   :  { %v1402_v5 = vld [vmem:[#allocation2] sm:$0xff]  ;;  %v1404_v6 = vld [vmem:[#allocation2 + $0x8] sm:$0xff]  ;;  %s1328_s21 = smov 124   ;;  %v1408_v7 = vld [vmem:[#allocation2 + $0x10] sm:$0xff]  ;;  %s1329_s0 = smov 126   ;;  %vm1154_vm0 = vcmask 203968  }
   0x9   :  { %34 = vrot.lane.b32.xlu0 %v32_v1, %s1324_s18  ;;  %65 = vrot.lane.b32.xlu2 %v63_v2, %s1325_s19  ;;  %s1330_s22 = smov 127   ;;  %s1331_s23 = smov 125   ;;  %vm1183_vm1 = vcmask 0  }
   0xa   :  { %112 = vrot.lane.b32.xlu1 %v1402_v5, %s1328_s21  ;;  %s1332_s24 = smov 98   ;;  %s1333_s25 = smov 97  }
   0xb   :  { %s1334_s26 = smov 96   ;;  %s1335_s27 = smov 101  }
   0xc   :  { %s1336_s28 = smov 100   ;;  %s1337_s29 = smov 99  }
   0xd   :  { %s1338_s30 = smov 104   ;;  %s1339_s3 = smov 103  }
   0xe   :  { %s1340_s4 = smov 102   ;;  %s1341_s5 = smov 107  }
   0xf   :  { %s1342_s6 = smov 106   ;;  %s1343_s7 = smov 105  }
  0x10   :  { %s1344_s8 = smov 110   ;;  %s1345_s9 = smov 109  }
  0x11   :  { %42 = vrot.lane.b32.xlu0 %v40_v3, %s1326_s1  ;;  %114 = vrot.lane.b32.xlu2 %v1404_v6, %s1328_s21  ;;  %s1346_s10 = smov 108   ;;  %s1347_s11 = smov 113  }
  0x12   :  { %s1348_s12 = smov 112   ;;  %s1349_s13 = smov 111  }
  0x13   :  { %s1350_s14 = smov 116   ;;  %s1351_s16 = smov 115  }
  0x14   :  { %s1352_s17 = smov 114   ;;  %s1353_s18 = smov 118  }
  0x15   :  { %s1354_s19 = smov 117   ;;  %s1355_s1 = smov 24  }
  0x19   :  { %88 = vrot.lane.b32.xlu0 %v86_v4, %s1327_s20  ;;  %s1356_s20 = smov 23  }
  0x21   :  { %116 = vrot.lane.b32.xlu0 %v1408_v7, %s1328_s21  ;;  %s1357_s21 = smov 22  }
  0x63   :  { %v66_v8 = vpop.permute.xlu2 %65 }
  0x64   :  { %v68_v9 = vmul.f32 %v66_v8, %v1402_v5  ;;  %v70_v14 = vmul.f32 %v66_v8, %v1408_v7  ;;  %v69_v18 = vmul.f32 %v66_v8, %v1404_v6 }
  0x66   :  { %74 = vrot.lane.b32.xlu0 %v68_v9, %s1329_s0 }
  0x6b   :  { %v115_v23 = vpop.permute.xlu2 %114 }
  0x7b   :  { %v1413_v10 = vpop.permute.xlu0 %34 }
  0x7c   :  { %v113_v21 = vpop.permute.xlu1 %112  ;;  %v37_v28 = vmul.f32 %v1413_v10, %v1402_v5  ;;  %v38_v35 = vmul.f32 %v1413_v10, %v1404_v6  ;;  %v39_v53 = vmul.f32 %v1413_v10, %v1408_v7 }
  0x83   :  { %v43_v11 = vpop.permute.xlu0 %42 }
  0x84   :  { %v47_v12 = vmul.f32 %v43_v11, %v1408_v7  ;;  %v45_v13 = vmul.f32 %v43_v11, %v1402_v5  ;;  %v46_v16 = vmul.f32 %v43_v11, %v1404_v6 }
  0x86   :  { %55 = vrot.lane.b32.xlu2 %v47_v12, %s1330_s22  ;;  %51 = vrot.lane.b32.xlu1 %v45_v13, %s1330_s22 }
  0x8b   :  { %v89_v15 = vpop.permute.xlu0 %88 }
  0x8c   :  { %v93_v17 = vmul.f32 %v89_v15, %v1408_v7  ;;  %v92_v19 = vmul.f32 %v89_v15, %v1404_v6  ;;  %v91_v20 = vmul.f32 %v89_v15, %v1402_v5 }
  0x8e   :  { %78 = vrot.lane.b32.xlu2 %v70_v14, %s1329_s0  ;;  %53 = vrot.lane.b32.xlu1 %v46_v16, %s1330_s22 }
  0x8f   :  { %101 = vrot.lane.b32.xlu0 %v93_v17, %s1331_s23  ;;  %v1447_v17 = vld [vmem:[#allocation2 + $0x28] sm:$0xff] }
  0x93   :  { %v117_v25 = vpop.permute.xlu0 %116 }
  0x96   :  { %76 = vrot.lane.b32.xlu1 %v69_v18, %s1329_s0  ;;  %99 = vrot.lane.b32.xlu2 %v92_v19, %s1331_s23  ;;  %v1449_v18 = vld [vmem:[#allocation2 + $0x20] sm:$0xff] }
  0x9e   :  { %97 = vrot.lane.b32.xlu1 %v91_v20, %s1331_s23  ;;  %s1358_s23 = smov 21  }
  0xd8   :  { %v75_v30 = vpop.permute.xlu0 %74 }
  0xe0   :  { %v56_v26 = vpop.permute.xlu2 %55 }
  0xe1   :  { %v62_v54 = vadd.f32 %v56_v26, %v39_v53 }
  0xe8   :  { %v79_v34 = vpop.permute.xlu2 %78 }
  0xe9   :  { %v85_v59 = vadd.f32 %v79_v34, %v62_v54 }
  0xf0   :  { %v100_v43 = vpop.permute.xlu2 %99 }
  0xf8   :  { %v52_v22 = vpop.permute.xlu1 %51 }
  0xf9   :  { %v60_v29 = vadd.f32 %v52_v22, %v37_v28 }
  0xfb   :  { %v83_v31 = vadd.f32 %v75_v30, %v60_v29 }
 0x100   :  { %v54_v24 = vpop.permute.xlu1 %53 }
 0x101   :  { %v61_v37 = vadd.f32 %v54_v24, %v38_v35  ;;  %v102_v57 = vpop.permute.xlu0 %101 }
 0x102   :  { %v108_v60 = vadd.f32 %v102_v57, %v85_v59 }
 0x104   :  { %v123_v61 = vadd.f32 %v117_v25, %v108_v60 }
 0x106   :  { %v1435_v1 = vmax.f32 %v123_v61, 0.0 }
 0x108   :  { %v77_v27 = vpop.permute.xlu1 %76  ;;  %v830_v2 = vperm.slane %v1435_v1, 1  ;;  %v789_v3 = vperm.slane %v1435_v1, 0  ;;  %v953_v8 = vperm.slane %v1435_v1, 4  ;;  %v912_v9 = vperm.slane %v1435_v1, 3 }
 0x109   :  { %v84_v39 = vadd.f32 %v77_v27, %v61_v37  ;;  %v871_v10 = vperm.slane %v1435_v1, 2  ;;  %v1035_v11 = vperm.slane %v1435_v1, 6  ;;  %v994_v12 = vperm.slane %v1435_v1, 5 }
 0x10b   :  { %v107_v44 = vadd.f32 %v100_v43, %v84_v39 }
 0x10d   :  { %v122_v45 = vadd.f32 %v115_v23, %v107_v44 }
 0x10f   :  { %v125_v49 = vmax.f32 %v122_v45, 0.0 }
 0x110   :  { %v98_v32 = vpop.permute.xlu1 %97 }
 0x111   :  { %v106_v33 = vadd.f32 %v98_v32, %v83_v31  ;;  %v461_v50 = vperm.slane %v125_v49, 0  ;;  %v584_v55 = vperm.slane %v125_v49, 3  ;;  %v543_v56 = vperm.slane %v125_v49, 2 }
 0x112   :  { %v502_v58 = vperm.slane %v125_v49, 1  ;;  %v707_v62 = vperm.slane %v125_v49, 6  ;;  %v666_v63 = vperm.slane %v125_v49, 5  ;;  %v625_v0 = vperm.slane %v125_v49, 4 }
 0x113   :  { %v121_v36 = vadd.f32 %v113_v21, %v106_v33  ;;  %v748_v4 = vperm.slane %v125_v49, 7  ;;  %v1453_v21 = vld [vmem:[#allocation2 + $0x18] sm:$0xff] }
 0x115   :  { %v124_v38 = vmax.f32 %v121_v36, 0.0 }
 0x117   :  { %v215_v40 = vperm.slane %v124_v38, 2  ;;  %v174_v41 = vperm.slane %v124_v38, 1  ;;  %v133_v42 = vperm.slane %v124_v38, 0  ;;  %v338_v46 = vperm.slane %v124_v38, 5 }
 0x118   :  { %v297_v47 = vperm.slane %v124_v38, 4  ;;  %v256_v48 = vperm.slane %v124_v38, 3  ;;  %v420_v51 = vperm.slane %v124_v38, 7  ;;  %v379_v52 = vperm.slane %v124_v38, 6 }
 0x119   :  { %217 = vrot.lane.b32.xlu0 %v215_v40, %s1332_s24  ;;  %176 = vrot.lane.b32.xlu2 %v174_v41, %s1333_s25  ;;  %s1359_s24 = smov 20   ;;  %s1360_s25 = smov 19  }
 0x11a   :  { %135 = vrot.lane.b32.xlu1 %v133_v42, %s1334_s26  ;;  %s1361_s26 = smov 18  }
 0x121   :  { %340 = vrot.lane.b32.xlu0 %v338_v46, %s1335_s27  ;;  %299 = vrot.lane.b32.xlu2 %v297_v47, %s1336_s28  ;;  %s1362_s27 = smov 17   ;;  %s1363_s28 = smov 16  }
 0x122   :  { %258 = vrot.lane.b32.xlu1 %v256_v48, %s1337_s29  ;;  %s1364_s29 = smov 15  }
 0x129   :  { %463 = vrot.lane.b32.xlu0 %v461_v50, %s1338_s30  ;;  %422 = vrot.lane.b32.xlu2 %v420_v51, %s1339_s3  ;;  %s1365_s3 = smov 14  }
 0x12a   :  { %381 = vrot.lane.b32.xlu1 %v379_v52, %s1340_s4  ;;  %s1366_s4 = smov 13  }
 0x131   :  { %586 = vrot.lane.b32.xlu0 %v584_v55, %s1341_s5  ;;  %545 = vrot.lane.b32.xlu2 %v543_v56, %s1342_s6  ;;  %s1367_s5 = smov 12   ;;  %s1368_s6 = smov 11  }
 0x132   :  { %504 = vrot.lane.b32.xlu1 %v502_v58, %s1343_s7  ;;  %s1369_s7 = smov 10  }
 0x139   :  { %709 = vrot.lane.b32.xlu0 %v707_v62, %s1344_s8  ;;  %668 = vrot.lane.b32.xlu2 %v666_v63, %s1345_s9  ;;  %s1370_s8 = smov 9   ;;  %s1371_s9 = smov 119  }
 0x13a   :  { %627 = vrot.lane.b32.xlu1 %v625_v0, %s1346_s10  ;;  %s1372_s10 = smov 7  }
 0x141   :  { %832 = vrot.lane.b32.xlu0 %v830_v2, %s1347_s11  ;;  %791 = vrot.lane.b32.xlu2 %v789_v3, %s1348_s12  ;;  %s1374_s11 = smov 5   ;;  %s1375_s12 = smov 4  }
 0x142   :  { %750 = vrot.lane.b32.xlu1 %v748_v4, %s1349_s13  ;;  %s1376_s13 = smov 3  }
 0x149   :  { %955 = vrot.lane.b32.xlu0 %v953_v8, %s1350_s14  ;;  %914 = vrot.lane.b32.xlu2 %v912_v9, %s1351_s16  ;;  %s1377_s14 = smov 2   ;;  %s1378_s16 = smov 1  }
 0x14a   :  { %873 = vrot.lane.b32.xlu1 %v871_v10, %s1352_s17 }
 0x151   :  { %1037 = vrot.lane.b32.xlu2 %v1035_v11, %s1353_s18 }
 0x152   :  { %996 = vrot.lane.b32.xlu1 %v994_v12, %s1354_s19  ;;  %s1192_s19 = sshll.u32 %s1803_s2, 4  ;;  %s1193_s19 = int_to_ptr.hbm [resolvable:$true] %s1192_s19 }
 0x173   :  { %v177_v23 = vpop.permute.xlu2 %176 }
 0x174   :  { %v180_v24 = vmul.f32 %v177_v23, %v1404_v6  ;;  %v179_v25 = vmul.f32 %v177_v23, %v1402_v5  ;;  %v181_v26 = vmul.f32 %v177_v23, %v1408_v7  ;;  %v183_v27 = vmul.f32 %v177_v23, %v1449_v18 }
 0x175   :  { %v182_v28 = vmul.f32 %v177_v23, %v1453_v21  ;;  %v184_v30 = vmul.f32 %v177_v23, %v1447_v17 }
 0x17b   :  { %v300_v29 = vpop.permute.xlu2 %299 }
 0x17c   :  { %v302_v50 = vmul.f32 %v300_v29, %v1402_v5  ;;  %v303_v51 = vmul.f32 %v300_v29, %v1404_v6  ;;  %v304_v53 = vmul.f32 %v300_v29, %v1408_v7  ;;  %v305_v56 = vmul.f32 %v300_v29, %v1453_v21 }
 0x17d   :  { %v306_v57 = vmul.f32 %v300_v29, %v1449_v18  ;;  %v307_v58 = vmul.f32 %v300_v29, %v1447_v17 }
 0x183   :  { %v1465_v35 = vpop.permute.xlu2 %422 }
 0x184   :  { %v427_v29 = vmul.f32 %v1465_v35, %v1408_v7 }
 0x18b   :  { %v218_v31 = vpop.permute.xlu0 %217  ;;  %v1470_v39 = vpop.permute.xlu2 %545 }
 0x18c   :  { %v136_v13 = vpop.permute.xlu1 %135  ;;  %v222_v32 = vmul.f32 %v218_v31, %v1408_v7  ;;  %v220_v33 = vmul.f32 %v218_v31, %v1402_v5  ;;  %v221_v34 = vmul.f32 %v218_v31, %v1404_v6  ;;  %v225_v36 = vmul.f32 %v218_v31, %v1447_v17 }
 0x18d   :  { %v140_v14 = vmul.f32 %v136_v13, %v1408_v7  ;;  %v139_v15 = vmul.f32 %v136_v13, %v1404_v6  ;;  %v138_v16 = vmul.f32 %v136_v13, %v1402_v5  ;;  %v143_v19 = vmul.f32 %v136_v13, %v1447_v17 }
 0x18e   :  { %v142_v20 = vmul.f32 %v136_v13, %v1449_v18  ;;  %v141_v22 = vmul.f32 %v136_v13, %v1453_v21  ;;  %v223_v37 = vmul.f32 %v218_v31, %v1453_v21  ;;  %v224_v38 = vmul.f32 %v218_v31, %v1449_v18 }
 0x18f   :  { %154 = vrot.lane.b32.xlu1 %v140_v14, %s1355_s1  ;;  %152 = vrot.lane.b32.xlu0 %v139_v15, %s1355_s1 }
 0x190   :  { %150 = vrot.lane.b32.xlu2 %v138_v16, %s1355_s1 }
 0x193   :  { %v1475_v44 = vpop.permute.xlu2 %668  ;;  %v341_v48 = vpop.permute.xlu0 %340 }
 0x194   :  { %v259_v40 = vpop.permute.xlu1 %258  ;;  %v345_v62 = vmul.f32 %v341_v48, %v1408_v7  ;;  %v343_v63 = vmul.f32 %v341_v48, %v1402_v5  ;;  %v344_v0 = vmul.f32 %v341_v48, %v1404_v6  ;;  %v348_v8 = vmul.f32 %v341_v48, %v1447_v17 }
 0x195   :  { %v262_v41 = vmul.f32 %v259_v40, %v1404_v6  ;;  %v263_v42 = vmul.f32 %v259_v40, %v1408_v7  ;;  %v261_v43 = vmul.f32 %v259_v40, %v1402_v5  ;;  %v265_v45 = vmul.f32 %v259_v40, %v1449_v18 }
 0x196   :  { %v266_v46 = vmul.f32 %v259_v40, %v1447_v17  ;;  %v264_v47 = vmul.f32 %v259_v40, %v1453_v21  ;;  %v346_v9 = vmul.f32 %v341_v48, %v1453_v21  ;;  %v347_v10 = vmul.f32 %v341_v48, %v1449_v18 }
 0x197   :  { %160 = vrot.lane.b32.xlu1 %v143_v19, %s1355_s1  ;;  %158 = vrot.lane.b32.xlu0 %v142_v20, %s1355_s1 }
 0x198   :  { %156 = vrot.lane.b32.xlu2 %v141_v22, %s1355_s1 }
 0x19b   :  { %v1482_v52 = vpop.permute.xlu2 %791  ;;  %v1485_v54 = vpop.permute.xlu0 %463 }
 0x19c   :  { %v382_v49 = vpop.permute.xlu1 %381 }
 0x19d   :  { %v385_v12 = vmul.f32 %v382_v49, %v1404_v6  ;;  %v386_v13 = vmul.f32 %v382_v49, %v1408_v7  ;;  %v384_v14 = vmul.f32 %v382_v49, %v1402_v5  ;;  %v388_v20 = vmul.f32 %v382_v49, %v1449_v18 }
 0x19e   :  { %v389_v22 = vmul.f32 %v382_v49, %v1447_v17  ;;  %v387_v23 = vmul.f32 %v382_v49, %v1453_v21 }
 0x19f   :  { %193 = vrot.lane.b32.xlu1 %v180_v24, %s1356_s20  ;;  %191 = vrot.lane.b32.xlu0 %v179_v25, %s1356_s20 }
 0x1a0   :  { %195 = vrot.lane.b32.xlu2 %v181_v26, %s1356_s20 }
 0x1a3   :  { %v1492_v59 = vpop.permute.xlu2 %914  ;;  %v1494_v60 = vpop.permute.xlu0 %586 }
 0x1a4   :  { %v1487_v55 = vpop.permute.xlu1 %504 }
 0x1a7   :  { %199 = vrot.lane.b32.xlu1 %v183_v27, %s1356_s20  ;;  %197 = vrot.lane.b32.xlu0 %v182_v28, %s1356_s20  ;;  %v425_v27 = vmul.f32 %v1465_v35, %v1402_v5  ;;  %v426_v28 = vmul.f32 %v1465_v35, %v1404_v6 }
 0x1a8   :  { %201 = vrot.lane.b32.xlu2 %v184_v30, %s1356_s20 }
 0x1ab   :  { %v1501_v2 = vpop.permute.xlu2 %1037  ;;  %v1503_v3 = vpop.permute.xlu0 %709 }
 0x1ac   :  { %v1496_v61 = vpop.permute.xlu1 %627 }
 0x1af   :  { %236 = vrot.lane.b32.xlu0 %v222_v32, %s1357_s21  ;;  %232 = vrot.lane.b32.xlu1 %v220_v33, %s1357_s21  ;;  %v428_v33 = vmul.f32 %v1465_v35, %v1453_v21 }
 0x1b0   :  { %234 = vrot.lane.b32.xlu2 %v221_v34, %s1357_s21  ;;  %v429_v34 = vmul.f32 %v1465_v35, %v1449_v18 }
 0x1b3   :  { %v1515_v15 = vpop.permute.xlu0 %832 }
 0x1b4   :  { %v1505_v4 = vpop.permute.xlu1 %750 }
 0x1b7   :  { %242 = vrot.lane.b32.xlu0 %v225_v36, %s1357_s21  ;;  %238 = vrot.lane.b32.xlu1 %v223_v37, %s1357_s21  ;;  %v430_v36 = vmul.f32 %v1465_v35, %v1447_v17 }
 0x1b8   :  { %240 = vrot.lane.b32.xlu2 %v224_v38, %s1357_s21 }
 0x1bb   :  { %v1524_v24 = vpop.permute.xlu0 %955 }
 0x1bc   :  { %v1517_v16 = vpop.permute.xlu1 %873 }
 0x1bf   :  { %275 = vrot.lane.b32.xlu0 %v262_v41, %s1358_s23  ;;  %277 = vrot.lane.b32.xlu1 %v263_v42, %s1358_s23  ;;  %v468_v41 = vmul.f32 %v1485_v54, %v1408_v7  ;;  %v466_v42 = vmul.f32 %v1485_v54, %v1402_v5 }
 0x1c0   :  { %273 = vrot.lane.b32.xlu2 %v261_v43, %s1358_s23  ;;  %v467_v43 = vmul.f32 %v1485_v54, %v1404_v6 }
 0x1c4   :  { %v1526_v25 = vpop.permute.xlu1 %996 }
 0x1c7   :  { %281 = vrot.lane.b32.xlu0 %v265_v45, %s1358_s23  ;;  %283 = vrot.lane.b32.xlu1 %v266_v46, %s1358_s23 }
 0x1c8   :  { %279 = vrot.lane.b32.xlu2 %v264_v47, %s1358_s23 }
 0x1cf   :  { %314 = vrot.lane.b32.xlu0 %v302_v50, %s1359_s24  ;;  %316 = vrot.lane.b32.xlu1 %v303_v51, %s1359_s24  ;;  %v471_v50 = vmul.f32 %v1485_v54, %v1447_v17  ;;  %v469_v51 = vmul.f32 %v1485_v54, %v1453_v21 }
 0x1d0   :  { %318 = vrot.lane.b32.xlu2 %v304_v53, %s1359_s24  ;;  %v470_v53 = vmul.f32 %v1485_v54, %v1449_v18 }
 0x1d7   :  { %320 = vrot.lane.b32.xlu0 %v305_v56, %s1359_s24  ;;  %322 = vrot.lane.b32.xlu1 %v306_v57, %s1359_s24 }
 0x1d8   :  { %324 = vrot.lane.b32.xlu2 %v307_v58, %s1359_s24 }
 0x1df   :  { %359 = vrot.lane.b32.xlu0 %v345_v62, %s1360_s25  ;;  %355 = vrot.lane.b32.xlu1 %v343_v63, %s1360_s25 }
 0x1e0   :  { %357 = vrot.lane.b32.xlu2 %v344_v0, %s1360_s25 }
 0x1e7   :  { %365 = vrot.lane.b32.xlu0 %v348_v8, %s1360_s25  ;;  %361 = vrot.lane.b32.xlu1 %v346_v9, %s1360_s25  ;;  %v508_v9 = vmul.f32 %v1487_v55, %v1404_v6 }
 0x1e8   :  { %363 = vrot.lane.b32.xlu2 %v347_v10, %s1360_s25  ;;  %v509_v10 = vmul.f32 %v1487_v55, %v1408_v7 }
 0x1ea   :  { %v1510_v11 = vpop.permute.xlu2 %150 }
 0x1eb   :  { %v168_v54 = vadd.f32 %v1510_v11, %v1402_v5  ;;  %v511_v11 = vmul.f32 %v1487_v55, %v1449_v18 }
 0x1ef   :  { %398 = vrot.lane.b32.xlu0 %v385_v12, %s1361_s26  ;;  %400 = vrot.lane.b32.xlu1 %v386_v13, %s1361_s26  ;;  %v507_v12 = vmul.f32 %v1487_v55, %v1402_v5 }
 0x1f0   :  { %396 = vrot.lane.b32.xlu2 %v384_v14, %s1361_s26 }
 0x1f2   :  { %v1519_v19 = vpop.permute.xlu2 %156 }
 0x1f7   :  { %404 = vrot.lane.b32.xlu0 %v388_v20, %s1361_s26  ;;  %406 = vrot.lane.b32.xlu1 %v389_v22, %s1361_s26 }
 0x1f8   :  { %402 = vrot.lane.b32.xlu2 %v387_v23, %s1361_s26 }
 0x1fa   :  { %v196_v26 = vpop.permute.xlu2 %195 }
 0x1ff   :  { %437 = vrot.lane.b32.xlu0 %v425_v27, %s1362_s27  ;;  %439 = vrot.lane.b32.xlu1 %v426_v28, %s1362_s27 }
 0x200   :  { %441 = vrot.lane.b32.xlu2 %v427_v29, %s1362_s27 }
 0x201   :  { %v155_v30 = vpop.permute.xlu1 %154  ;;  %v153_v31 = vpop.permute.xlu0 %152 }
 0x202   :  { %v202_v32 = vpop.permute.xlu2 %201  ;;  %v169_v35 = vadd.f32 %v153_v31, %v1404_v6  ;;  %v170_v0 = vadd.f32 %v155_v30, %v1408_v7  ;;  %v512_v31 = vmul.f32 %v1487_v55, %v1447_v17 }
 0x204   :  { %v211_v14 = vadd.f32 %v196_v26, %v170_v0  ;;  %v510_v26 = vmul.f32 %v1487_v55, %v1453_v21  ;;  %v550_v55 = vmul.f32 %v1470_v39, %v1408_v7 }
 0x207   :  { %443 = vrot.lane.b32.xlu0 %v428_v33, %s1362_s27  ;;  %445 = vrot.lane.b32.xlu1 %v429_v34, %s1362_s27  ;;  %v171_v33 = vadd.f32 %v1519_v19, %v1453_v21  ;;  %v549_v19 = vmul.f32 %v1470_v39, %v1404_v6 }
 0x208   :  { %447 = vrot.lane.b32.xlu2 %v430_v36, %s1362_s27 }
 0x209   :  { %v161_v37 = vpop.permute.xlu1 %160  ;;  %v159_v38 = vpop.permute.xlu0 %158 }
 0x20a   :  { %v235_v40 = vpop.permute.xlu2 %234  ;;  %v172_v56 = vadd.f32 %v159_v38, %v1449_v18  ;;  %v173_v29 = vadd.f32 %v161_v37, %v1447_v17 }
 0x20c   :  { %v214_v36 = vadd.f32 %v202_v32, %v173_v29 }
 0x20f   :  { %482 = vrot.lane.b32.xlu0 %v468_v41, %s1363_s28  ;;  %478 = vrot.lane.b32.xlu1 %v466_v42, %s1363_s28 }
 0x210   :  { %480 = vrot.lane.b32.xlu2 %v467_v43, %s1363_s28 }
 0x211   :  { %v194_v45 = vpop.permute.xlu1 %193  ;;  %v192_v46 = vpop.permute.xlu0 %191 }
 0x212   :  { %v210_v47 = vadd.f32 %v194_v45, %v169_v35  ;;  %v241_v48 = vpop.permute.xlu2 %240  ;;  %v209_v13 = vadd.f32 %v192_v46, %v168_v54  ;;  %v548_v35 = vmul.f32 %v1470_v39, %v1402_v5  ;;  %v590_v54 = vmul.f32 %v1494_v60, %v1404_v6 }
 0x214   :  { %v251_v49 = vadd.f32 %v235_v40, %v210_v47 }
 0x217   :  { %488 = vrot.lane.b32.xlu0 %v471_v50, %s1363_s28  ;;  %484 = vrot.lane.b32.xlu1 %v469_v51, %s1363_s28  ;;  %v551_v51 = vmul.f32 %v1470_v39, %v1453_v21 }
 0x218   :  { %486 = vrot.lane.b32.xlu2 %v470_v53, %s1363_s28  ;;  %v552_v53 = vmul.f32 %v1470_v39, %v1449_v18 }
 0x219   :  { %v200_v57 = vpop.permute.xlu1 %199  ;;  %v198_v58 = vpop.permute.xlu0 %197 }
 0x21a   :  { %v213_v62 = vadd.f32 %v200_v57, %v172_v56  ;;  %v274_v63 = vpop.permute.xlu2 %273  ;;  %v212_v34 = vadd.f32 %v198_v58, %v171_v33  ;;  %v553_v56 = vmul.f32 %v1470_v39, %v1447_v17 }
 0x21c   :  { %v254_v8 = vadd.f32 %v241_v48, %v213_v62 }
 0x21f   :  { %521 = vrot.lane.b32.xlu0 %v508_v9, %s1364_s29  ;;  %523 = vrot.lane.b32.xlu1 %v509_v10, %s1364_s29  ;;  %v589_v10 = vmul.f32 %v1494_v60, %v1402_v5 }
 0x220   :  { %519 = vrot.lane.b32.xlu2 %v507_v12, %s1364_s29 }
 0x221   :  { %v233_v20 = vpop.permute.xlu1 %232  ;;  %v237_v22 = vpop.permute.xlu0 %236 }
 0x222   :  { %v280_v23 = vpop.permute.xlu2 %279  ;;  %v250_v27 = vadd.f32 %v233_v20, %v209_v13  ;;  %v252_v28 = vadd.f32 %v237_v22, %v211_v14  ;;  %v594_v22 = vmul.f32 %v1494_v60, %v1447_v17 }
 0x224   :  { %v291_v30 = vadd.f32 %v274_v63, %v250_v27  ;;  %v593_v27 = vmul.f32 %v1494_v60, %v1449_v18 }
 0x227   :  { %527 = vrot.lane.b32.xlu0 %v511_v11, %s1364_s29  ;;  %529 = vrot.lane.b32.xlu1 %v512_v31, %s1364_s29 }
 0x228   :  { %525 = vrot.lane.b32.xlu2 %v510_v26, %s1364_s29 }
 0x229   :  { %v239_v38 = vpop.permute.xlu1 %238  ;;  %v243_v37 = vpop.permute.xlu0 %242 }
 0x22a   :  { %v319_v40 = vpop.permute.xlu2 %318  ;;  %v253_v41 = vadd.f32 %v239_v38, %v212_v34  ;;  %v255_v42 = vadd.f32 %v243_v37, %v214_v36  ;;  %v632_v34 = vmul.f32 %v1496_v61, %v1408_v7  ;;  %v630_v36 = vmul.f32 %v1496_v61, %v1402_v5 }
 0x22c   :  { %v294_v43 = vadd.f32 %v280_v23, %v253_v41  ;;  %v592_v23 = vmul.f32 %v1494_v60, %v1453_v21 }
 0x22f   :  { %560 = vrot.lane.b32.xlu0 %v548_v35, %s1365_s3  ;;  %562 = vrot.lane.b32.xlu1 %v549_v19, %s1365_s3  ;;  %v635_v35 = vmul.f32 %v1496_v61, %v1447_v17  ;;  %v633_v19 = vmul.f32 %v1496_v61, %v1453_v21 }
 0x230   :  { %564 = vrot.lane.b32.xlu2 %v550_v55, %s1365_s3 }
 0x231   :  { %v278_v32 = vpop.permute.xlu1 %277  ;;  %v276_v45 = vpop.permute.xlu0 %275 }
 0x232   :  { %v325_v46 = vpop.permute.xlu2 %324  ;;  %v293_v47 = vadd.f32 %v278_v32, %v252_v28  ;;  %v292_v48 = vadd.f32 %v276_v45, %v251_v49  ;;  %v591_v49 = vmul.f32 %v1494_v60, %v1408_v7 }
 0x234   :  { %v334_v50 = vadd.f32 %v319_v40, %v293_v47 }
 0x237   :  { %566 = vrot.lane.b32.xlu0 %v551_v51, %s1365_s3  ;;  %568 = vrot.lane.b32.xlu1 %v552_v53, %s1365_s3  ;;  %v672_v51 = vmul.f32 %v1475_v44, %v1404_v6  ;;  %v673_v53 = vmul.f32 %v1475_v44, %v1408_v7 }
 0x238   :  { %570 = vrot.lane.b32.xlu2 %v553_v56, %s1365_s3 }
 0x239   :  { %v284_v57 = vpop.permute.xlu1 %283  ;;  %v282_v58 = vpop.permute.xlu0 %281 }
 0x23a   :  { %v296_v62 = vadd.f32 %v284_v57, %v255_v42  ;;  %v358_v63 = vpop.permute.xlu2 %357  ;;  %v295_v0 = vadd.f32 %v282_v58, %v254_v8 }
 0x23c   :  { %v337_v9 = vadd.f32 %v325_v46, %v296_v62 }
 0x23f   :  { %605 = vrot.lane.b32.xlu0 %v591_v49, %s1366_s4  ;;  %601 = vrot.lane.b32.xlu1 %v589_v10, %s1366_s4  ;;  %v676_v49 = vmul.f32 %v1475_v44, %v1447_v17 }
 0x240   :  { %603 = vrot.lane.b32.xlu2 %v590_v54, %s1366_s4 }
 0x241   :  { %v317_v39 = vpop.permute.xlu1 %316  ;;  %v315_v12 = vpop.permute.xlu0 %314 }
 0x242   :  { %v333_v13 = vadd.f32 %v317_v39, %v292_v48  ;;  %v364_v14 = vpop.permute.xlu2 %363  ;;  %v332_v20 = vadd.f32 %v315_v12, %v291_v30  ;;  %v631_v30 = vmul.f32 %v1496_v61, %v1404_v6 }
 0x244   :  { %v374_v8 = vadd.f32 %v358_v63, %v333_v13 }
 0x247   :  { %611 = vrot.lane.b32.xlu0 %v594_v22, %s1366_s4  ;;  %607 = vrot.lane.b32.xlu1 %v592_v23, %s1366_s4  ;;  %v713_v22 = vmul.f32 %v1503_v3, %v1404_v6 }
 0x248   :  { %609 = vrot.lane.b32.xlu2 %v593_v27, %s1366_s4 }
 0x249   :  { %v323_v28 = vpop.permute.xlu1 %322  ;;  %v321_v29 = vpop.permute.xlu0 %320 }
 0x24a   :  { %v336_v11 = vadd.f32 %v323_v28, %v295_v0  ;;  %v397_v31 = vpop.permute.xlu2 %396  ;;  %v335_v33 = vadd.f32 %v321_v29, %v294_v43  ;;  %v634_v43 = vmul.f32 %v1496_v61, %v1449_v18  ;;  %v674_v0 = vmul.f32 %v1475_v44, %v1453_v21 }
 0x24c   :  { %v377_v26 = vadd.f32 %v364_v14, %v336_v11 }
 0x24f   :  { %644 = vrot.lane.b32.xlu0 %v631_v30, %s1367_s5  ;;  %646 = vrot.lane.b32.xlu1 %v632_v34, %s1367_s5 }
 0x250   :  { %642 = vrot.lane.b32.xlu2 %v630_v36, %s1367_s5 }
 0x251   :  { %v356_v60 = vpop.permute.xlu1 %355  ;;  %v360_v38 = vpop.permute.xlu0 %359 }
 0x252   :  { %v403_v37 = vpop.permute.xlu2 %402  ;;  %v373_v40 = vadd.f32 %v356_v60, %v332_v20  ;;  %v375_v41 = vadd.f32 %v360_v38, %v334_v50  ;;  %v671_v50 = vmul.f32 %v1475_v44, %v1402_v5  ;;  %v714_v20 = vmul.f32 %v1503_v3, %v1408_v7 }
 0x254   :  { %v414_v42 = vadd.f32 %v397_v31, %v373_v40  ;;  %v717_v31 = vmul.f32 %v1503_v3, %v1447_v17  ;;  %v754_v40 = vmul.f32 %v1505_v4, %v1404_v6 }
 0x257   :  { %650 = vrot.lane.b32.xlu0 %v634_v43, %s1367_s5  ;;  %652 = vrot.lane.b32.xlu1 %v635_v35, %s1367_s5 }
 0x258   :  { %648 = vrot.lane.b32.xlu2 %v633_v19, %s1367_s5 }
 0x259   :  { %v362_v55 = vpop.permute.xlu1 %361  ;;  %v366_v32 = vpop.permute.xlu0 %365 }
 0x25a   :  { %v442_v45 = vpop.permute.xlu2 %441  ;;  %v376_v46 = vadd.f32 %v362_v55, %v335_v33  ;;  %v378_v47 = vadd.f32 %v366_v32, %v337_v9  ;;  %v675_v9 = vmul.f32 %v1475_v44, %v1449_v18  ;;  %v715_v33 = vmul.f32 %v1503_v3, %v1453_v21 }
 0x25c   :  { %v417_v48 = vadd.f32 %v403_v37, %v376_v46  ;;  %v758_v46 = vmul.f32 %v1505_v4, %v1447_v17 }
 0x25f   :  { %683 = vrot.lane.b32.xlu0 %v671_v50, %s1368_s6  ;;  %685 = vrot.lane.b32.xlu1 %v672_v51, %s1368_s6 }
 0x260   :  { %687 = vrot.lane.b32.xlu2 %v673_v53, %s1368_s6 }
 0x261   :  { %v401_v61 = vpop.permute.xlu1 %400  ;;  %v399_v56 = vpop.permute.xlu0 %398 }
 0x262   :  { %v448_v57 = vpop.permute.xlu2 %447  ;;  %v416_v58 = vadd.f32 %v401_v61, %v375_v41  ;;  %v415_v62 = vadd.f32 %v399_v56, %v374_v8  ;;  %v712_v8 = vmul.f32 %v1503_v3, %v1402_v5  ;;  %v755_v41 = vmul.f32 %v1505_v4, %v1408_v7 }
 0x264   :  { %v457_v63 = vadd.f32 %v442_v45, %v416_v58  ;;  %v757_v45 = vmul.f32 %v1505_v4, %v1449_v18  ;;  %v795_v58 = vmul.f32 %v1482_v52, %v1404_v6 }
 0x267   :  { %689 = vrot.lane.b32.xlu0 %v674_v0, %s1368_s6  ;;  %691 = vrot.lane.b32.xlu1 %v675_v9, %s1368_s6 }
 0x268   :  { %693 = vrot.lane.b32.xlu2 %v676_v49, %s1368_s6 }
 0x269   :  { %v407_v10 = vpop.permute.xlu1 %406  ;;  %v405_v54 = vpop.permute.xlu0 %404 }
 0x26a   :  { %v419_v39 = vadd.f32 %v407_v10, %v378_v47  ;;  %v481_v12 = vpop.permute.xlu2 %480  ;;  %v418_v13 = vadd.f32 %v405_v54, %v377_v26  ;;  %v716_v26 = vmul.f32 %v1503_v3, %v1449_v18  ;;  %v756_v47 = vmul.f32 %v1505_v4, %v1453_v21 }
 0x26b   :  { %v797_v54 = vmul.f32 %v1482_v52, %v1453_v21 }
 0x26c   :  { %v460_v14 = vadd.f32 %v448_v57, %v419_v39  ;;  %v794_v57 = vmul.f32 %v1482_v52, %v1402_v5  ;;  %v798_v39 = vmul.f32 %v1482_v52, %v1449_v18 }
 0x26f   :  { %728 = vrot.lane.b32.xlu0 %v714_v20, %s1369_s7  ;;  %724 = vrot.lane.b32.xlu1 %v712_v8, %s1369_s7 }
 0x270   :  { %726 = vrot.lane.b32.xlu2 %v713_v22, %s1369_s7 }
 0x271   :  { %v440_v44 = vpop.permute.xlu1 %439  ;;  %v438_v23 = vpop.permute.xlu0 %437 }
 0x272   :  { %v456_v27 = vadd.f32 %v440_v44, %v415_v62  ;;  %v487_v28 = vpop.permute.xlu2 %486  ;;  %v455_v29 = vadd.f32 %v438_v23, %v414_v42  ;;  %v753_v42 = vmul.f32 %v1505_v4, %v1402_v5  ;;  %v796_v62 = vmul.f32 %v1482_v52, %v1408_v7 }
 0x273   :  { %v1076_v23 = vperm.slane %v1435_v1, 7  ;;  %v837_v1 = vmul.f32 %v1515_v15, %v1408_v7 }
 0x274   :  { %v497_v11 = vadd.f32 %v481_v12, %v456_v27  ;;  %v799_v12 = vmul.f32 %v1482_v52, %v1447_v17  ;;  %v835_v27 = vmul.f32 %v1515_v15, %v1402_v5  ;;  %v836_v52 = vmul.f32 %v1515_v15, %v1404_v6 }
 0x275   :  { %v838_v5 = vmul.f32 %v1515_v15, %v1453_v21  ;;  %v839_v6 = vmul.f32 %v1515_v15, %v1449_v18 }
 0x277   :  { %734 = vrot.lane.b32.xlu0 %v717_v31, %s1369_s7  ;;  %730 = vrot.lane.b32.xlu1 %v715_v33, %s1369_s7 }
 0x278   :  { %732 = vrot.lane.b32.xlu2 %v716_v26, %s1369_s7 }
 0x279   :  { %v446_v30 = vpop.permute.xlu1 %445  ;;  %v444_v34 = vpop.permute.xlu0 %443 }
 0x27a   :  { %v459_v36 = vadd.f32 %v446_v30, %v418_v13  ;;  %v520_v60 = vpop.permute.xlu2 %519  ;;  %v458_v38 = vadd.f32 %v444_v34, %v417_v48 }
 0x27c   :  { %v500_v37 = vadd.f32 %v487_v28, %v459_v36 }
 0x27f   :  { %767 = vrot.lane.b32.xlu0 %v754_v40, %s1370_s8  ;;  %769 = vrot.lane.b32.xlu1 %v755_v41, %s1370_s8  ;;  %v840_v40 = vmul.f32 %v1515_v15, %v1447_v17  ;;  %v1675_v41 = vld [vmem:[#allocation2] sm:$0xff] }
 0x280   :  { %765 = vrot.lane.b32.xlu2 %v753_v42, %s1370_s8  ;;  %v876_v7 = vmul.f32 %v1675_v41, %v1517_v16  ;;  %v1679_v42 = vld [vmem:[#allocation2 + $0x8] sm:$0xff] }
 0x281   :  { %v479_v3 = vpop.permute.xlu1 %478  ;;  %v483_v43 = vpop.permute.xlu0 %482 }
 0x282   :  { %v526_v35 = vpop.permute.xlu2 %525  ;;  %v496_v19 = vadd.f32 %v479_v3, %v455_v29  ;;  %v498_v55 = vadd.f32 %v483_v43, %v457_v63  ;;  %v877_v3 = vmul.f32 %v1679_v42, %v1517_v16 }
 0x284   :  { %v537_v32 = vadd.f32 %v520_v60, %v496_v19 }
 0x287   :  { %773 = vrot.lane.b32.xlu0 %v757_v45, %s1370_s8  ;;  %775 = vrot.lane.b32.xlu1 %v758_v46, %s1370_s8  ;;  %v1685_v45 = vld [vmem:[#allocation2 + $0x10] sm:$0xff] }
 0x288   :  { %771 = vrot.lane.b32.xlu2 %v756_v47, %s1370_s8  ;;  %v878_v46 = vmul.f32 %v1685_v45, %v1517_v16  ;;  %v917_v47 = vmul.f32 %v1675_v41, %v1492_v59 }
 0x289   :  { %v485_v48 = vpop.permute.xlu1 %484  ;;  %v489_v50 = vpop.permute.xlu0 %488 }
 0x28a   :  { %v565_v51 = vpop.permute.xlu2 %564  ;;  %v499_v53 = vadd.f32 %v485_v48, %v458_v38  ;;  %v501_v61 = vadd.f32 %v489_v50, %v460_v14  ;;  %v918_v48 = vmul.f32 %v1679_v42, %v1492_v59 }
 0x28c   :  { %v540_v56 = vadd.f32 %v526_v35, %v499_v53 }
 0x28f   :  { %806 = vrot.lane.b32.xlu0 %v794_v57, %s1323_s15  ;;  %808 = vrot.lane.b32.xlu1 %v795_v58, %s1323_s15  ;;  %v879_v58 = vmul.f32 %v1517_v16, %v1453_v21 }
 0x290   :  { %810 = vrot.lane.b32.xlu2 %v796_v62, %s1323_s15  ;;  %v919_v62 = vmul.f32 %v1685_v45, %v1492_v59 }
 0x291   :  { %v524_v4 = vpop.permute.xlu1 %523  ;;  %v522_v63 = vpop.permute.xlu0 %521 }
 0x292   :  { %v571_v0 = vpop.permute.xlu2 %570  ;;  %v539_v9 = vadd.f32 %v524_v4, %v498_v55  ;;  %v538_v49 = vadd.f32 %v522_v63, %v497_v11  ;;  %v958_v4 = vmul.f32 %v1675_v41, %v1524_v24 }
 0x294   :  { %v580_v10 = vadd.f32 %v565_v51, %v539_v9 }
 0x297   :  { %812 = vrot.lane.b32.xlu0 %v797_v54, %s1323_s15  ;;  %814 = vrot.lane.b32.xlu1 %v798_v39, %s1323_s15  ;;  %v880_v39 = vmul.f32 %v1517_v16, %v1449_v18 }
 0x298   :  { %816 = vrot.lane.b32.xlu2 %v799_v12, %s1323_s15  ;;  %s1373_s15 = smov 6   ;;  %v959_v12 = vmul.f32 %v1679_v42, %v1524_v24 }
 0x299   :  { %v530_v13 = vpop.permute.xlu1 %529  ;;  %v528_v14 = vpop.permute.xlu0 %527 }
 0x29a   :  { %v542_v20 = vadd.f32 %v530_v13, %v501_v61  ;;  %v604_v8 = vpop.permute.xlu2 %603  ;;  %v541_v22 = vadd.f32 %v528_v14, %v500_v37  ;;  %v920_v13 = vmul.f32 %v1492_v59, %v1453_v21 }
 0x29c   :  { %v583_v44 = vadd.f32 %v571_v0, %v542_v20 }
 0x29f   :  { %1078 = vrot.lane.b32.xlu0 %v1076_v23, %s1371_s9  ;;  %847 = vrot.lane.b32.xlu1 %v835_v27, %s1372_s10  ;;  %v999_v27 = vmul.f32 %v1675_v41, %v1526_v25 }
 0x2a0   :  { %849 = vrot.lane.b32.xlu2 %v836_v52, %s1372_s10  ;;  %v960_v52 = vmul.f32 %v1685_v45, %v1524_v24 }
 0x2a1   :  { %v563_v28 = vpop.permute.xlu1 %562  ;;  %v561_v29 = vpop.permute.xlu0 %560 }
 0x2a2   :  { %v579_v11 = vadd.f32 %v563_v28, %v538_v49  ;;  %v610_v31 = vpop.permute.xlu2 %609  ;;  %v578_v33 = vadd.f32 %v561_v29, %v537_v32  ;;  %v1000_v28 = vmul.f32 %v1679_v42, %v1526_v25 }
 0x2a4   :  { %v620_v26 = vadd.f32 %v604_v8, %v579_v11 }
 0x2a7   :  { %851 = vrot.lane.b32.xlu0 %v837_v1, %s1372_s10  ;;  %853 = vrot.lane.b32.xlu1 %v838_v5, %s1372_s10  ;;  %v921_v5 = vmul.f32 %v1492_v59, %v1449_v18 }
 0x2a8   :  { %855 = vrot.lane.b32.xlu2 %v839_v6, %s1372_s10  ;;  %v881_v6 = vmul.f32 %v1517_v16, %v1447_v17  ;;  %v1001_v16 = vmul.f32 %v1685_v45, %v1526_v25 }
 0x2a9   :  { %v569_v30 = vpop.permute.xlu1 %568  ;;  %v567_v34 = vpop.permute.xlu0 %566 }
 0x2aa   :  { %v582_v36 = vadd.f32 %v569_v30, %v541_v22  ;;  %v643_v60 = vpop.permute.xlu2 %642  ;;  %v581_v38 = vadd.f32 %v567_v34, %v540_v56  ;;  %v961_v30 = vmul.f32 %v1524_v24, %v1453_v21 }
 0x2ac   :  { %v623_v37 = vadd.f32 %v610_v31, %v582_v36 }
 0x2af   :  { %857 = vrot.lane.b32.xlu0 %v840_v40, %s1372_s10  ;;  %888 = vrot.lane.b32.xlu1 %v876_v7, %s1373_s15  ;;  %v1040_v7 = vmul.f32 %v1675_v41, %v1501_v2 }
 0x2b0   :  { %890 = vrot.lane.b32.xlu2 %v877_v3, %s1373_s15  ;;  %v1041_v3 = vmul.f32 %v1679_v42, %v1501_v2 }
 0x2b1   :  { %v602_v43 = vpop.permute.xlu1 %601  ;;  %v606_v35 = vpop.permute.xlu0 %605 }
 0x2b2   :  { %v649_v19 = vpop.permute.xlu2 %648  ;;  %v619_v15 = vadd.f32 %v602_v43, %v578_v33  ;;  %v621_v55 = vadd.f32 %v606_v35, %v580_v10 }
 0x2b4   :  { %v660_v32 = vadd.f32 %v643_v60, %v619_v15 }
 0x2b7   :  { %892 = vrot.lane.b32.xlu0 %v878_v46, %s1373_s15  ;;  %929 = vrot.lane.b32.xlu1 %v917_v47, %s1374_s11  ;;  %v962_v46 = vmul.f32 %v1524_v24, %v1449_v18  ;;  %v922_v47 = vmul.f32 %v1492_v59, %v1447_v17  ;;  %v1042_v18 = vmul.f32 %v1685_v45, %v1501_v2 }
 0x2b8   :  { %931 = vrot.lane.b32.xlu2 %v918_v48, %s1374_s11  ;;  %v1002_v48 = vmul.f32 %v1526_v25, %v1453_v21 }
 0x2b9   :  { %v608_v50 = vpop.permute.xlu1 %607  ;;  %v612_v51 = vpop.permute.xlu0 %611 }
 0x2ba   :  { %v688_v53 = vpop.permute.xlu2 %687  ;;  %v622_v61 = vadd.f32 %v608_v50, %v581_v38  ;;  %v624_v56 = vadd.f32 %v612_v51, %v583_v44 }
 0x2bc   :  { %v663_v57 = vadd.f32 %v649_v19, %v622_v61 }
 0x2bf   :  { %894 = vrot.lane.b32.xlu0 %v879_v58, %s1373_s15  ;;  %933 = vrot.lane.b32.xlu1 %v919_v62, %s1374_s11 }
 0x2c0   :  { %970 = vrot.lane.b32.xlu2 %v958_v4, %s1375_s12 }
 0x2c1   :  { %v647_v63 = vpop.permute.xlu1 %646  ;;  %v645_v0 = vpop.permute.xlu0 %644 }
 0x2c2   :  { %v694_v9 = vpop.permute.xlu2 %693  ;;  %v662_v49 = vadd.f32 %v647_v63, %v621_v55  ;;  %v661_v10 = vadd.f32 %v645_v0, %v620_v26  ;;  %v963_v0 = vmul.f32 %v1524_v24, %v1447_v17 }
 0x2c4   :  { %v703_v54 = vadd.f32 %v688_v53, %v662_v49 }
 0x2c7   :  { %896 = vrot.lane.b32.xlu1 %v880_v39, %s1373_s15  ;;  %972 = vrot.lane.b32.xlu0 %v959_v12, %s1375_s12 }
 0x2c8   :  { %935 = vrot.lane.b32.xlu2 %v920_v13, %s1374_s11 }
 0x2c9   :  { %v653_v14 = vpop.permute.xlu1 %652  ;;  %v651_v20 = vpop.permute.xlu0 %650 }
 0x2ca   :  { %v665_v8 = vadd.f32 %v653_v14, %v624_v56  ;;  %v727_v22 = vpop.permute.xlu2 %726  ;;  %v664_v44 = vadd.f32 %v651_v20, %v623_v37 }
 0x2cc   :  { %v706_v23 = vadd.f32 %v694_v9, %v665_v8 }
 0x2cf   :  { %1011 = vrot.lane.b32.xlu1 %v999_v27, %s1376_s13  ;;  %974 = vrot.lane.b32.xlu0 %v960_v52, %s1375_s12 }
 0x2d0   :  { %1013 = vrot.lane.b32.xlu2 %v1000_v28, %s1376_s13 }
 0x2d1   :  { %v686_v29 = vpop.permute.xlu1 %685  ;;  %v684_v11 = vpop.permute.xlu0 %683 }
 0x2d2   :  { %v702_v31 = vadd.f32 %v686_v29, %v661_v10  ;;  %v733_v33 = vpop.permute.xlu2 %732  ;;  %v701_v26 = vadd.f32 %v684_v11, %v660_v32 }
 0x2d4   :  { %v743_v1 = vadd.f32 %v727_v22, %v702_v31 }
 0x2d7   :  { %937 = vrot.lane.b32.xlu1 %v921_v5, %s1374_s11  ;;  %898 = vrot.lane.b32.xlu0 %v881_v6, %s1373_s15 }
 0x2d8   :  { %976 = vrot.lane.b32.xlu2 %v961_v30, %s1375_s12 }
 0x2d9   :  { %v692_v34 = vpop.permute.xlu1 %691  ;;  %v690_v36 = vpop.permute.xlu0 %689 }
 0x2da   :  { %v705_v60 = vadd.f32 %v692_v34, %v664_v44  ;;  %v766_v38 = vpop.permute.xlu2 %765  ;;  %v704_v37 = vadd.f32 %v690_v36, %v663_v57 }
 0x2dc   :  { %v746_v40 = vadd.f32 %v733_v33, %v705_v60 }
 0x2df   :  { %1052 = vrot.lane.b32.xlu1 %v1040_v7, %s1377_s14  ;;  %1015 = vrot.lane.b32.xlu0 %v1001_v16, %s1376_s13  ;;  %v1267_v16 = vld [vmem:[#allocation2 + $0x20] sm:$0xff] }
 0x2e0   :  { %1054 = vrot.lane.b32.xlu2 %v1041_v3, %s1377_s14  ;;  %v1003_v3 = vmul.f32 %v1267_v16, %v1526_v25 }
 0x2e1   :  { %v725_v43 = vpop.permute.xlu1 %724  ;;  %v729_v35 = vpop.permute.xlu0 %728 }
 0x2e2   :  { %v772_v19 = vpop.permute.xlu2 %771  ;;  %v742_v15 = vadd.f32 %v725_v43, %v701_v26  ;;  %v744_v55 = vadd.f32 %v729_v35, %v703_v54 }
 0x2e4   :  { %v783_v32 = vadd.f32 %v766_v38, %v742_v15 }
 0x2e7   :  { %978 = vrot.lane.b32.xlu1 %v962_v46, %s1375_s12  ;;  %939 = vrot.lane.b32.xlu0 %v922_v47, %s1374_s11  ;;  %v1044_v46 = vmul.f32 %v1267_v16, %v1501_v2 }
 0x2e8   :  { %1017 = vrot.lane.b32.xlu2 %v1002_v48, %s1376_s13 }
 0x2e9   :  { %v731_v50 = vpop.permute.xlu1 %730  ;;  %v735_v51 = vpop.permute.xlu0 %734 }
 0x2ea   :  { %v811_v53 = vpop.permute.xlu2 %810  ;;  %v745_v61 = vadd.f32 %v731_v50, %v704_v37  ;;  %v747_v56 = vadd.f32 %v735_v51, %v706_v23  ;;  %v1266_v37 = vld [vmem:[#allocation2 + $0x18] sm:$0xff] }
 0x2eb   :  { %v1043_v7 = vmul.f32 %v1266_v37, %v1501_v2 }
 0x2ec   :  { %v786_v57 = vadd.f32 %v772_v19, %v745_v61 }
 0x2ef   :  { %1056 = vrot.lane.b32.xlu0 %v1042_v18, %s1377_s14 }
 0x2f1   :  { %v770_v59 = vpop.permute.xlu1 %769  ;;  %v768_v58 = vpop.permute.xlu0 %767 }
 0x2f2   :  { %v817_v21 = vpop.permute.xlu2 %816  ;;  %v785_v62 = vadd.f32 %v770_v59, %v744_v55  ;;  %v784_v4 = vadd.f32 %v768_v58, %v743_v1  ;;  %v1268_v55 = vld [vmem:[#allocation2 + $0x28] sm:$0xff] }
 0x2f3   :  { %v1004_v47 = vmul.f32 %v1268_v55, %v1526_v25 }
 0x2f4   :  { %v826_v63 = vadd.f32 %v811_v53, %v785_v62 }
 0x2f7   :  { %980 = vrot.lane.b32.xlu0 %v963_v0, %s1375_s12 }
 0x2f9   :  { %v776_v9 = vpop.permute.xlu1 %775  ;;  %v774_v49 = vpop.permute.xlu0 %773 }
 0x2fa   :  { %v788_v10 = vadd.f32 %v776_v9, %v747_v56  ;;  %v850_v54 = vpop.permute.xlu2 %849  ;;  %v787_v39 = vadd.f32 %v774_v49, %v746_v40  ;;  %v1123_v49 = vld [vmem:[#allocation2] sm:$0x1] }
 0x2fc   :  { %v829_v12 = vadd.f32 %v817_v21, %v788_v10 }
 0x301   :  { %v809_v13 = vpop.permute.xlu1 %808  ;;  %v807_v14 = vpop.permute.xlu0 %806 }
 0x302   :  { %v825_v20 = vadd.f32 %v809_v13, %v784_v4  ;;  %v856_v8 = vpop.permute.xlu2 %855  ;;  %v824_v22 = vadd.f32 %v807_v14, %v783_v32  ;;  %v1045_v32 = vmul.f32 %v1268_v55, %v1501_v2 }
 0x304   :  { %v866_v44 = vadd.f32 %v850_v54, %v825_v20 }
 0x309   :  { %v815_v23 = vpop.permute.xlu1 %814  ;;  %v813_v27 = vpop.permute.xlu0 %812 }
 0x30a   :  { %v828_v52 = vadd.f32 %v815_v23, %v787_v39  ;;  %v891_v28 = vpop.permute.xlu2 %890  ;;  %v827_v29 = vadd.f32 %v813_v27, %v786_v57 }
 0x30b   :  { %v907_v17 = vadd.f32 %v891_v28, %v866_v44 }
 0x30c   :  { %v869_v24 = vadd.f32 %v856_v8, %v828_v52 }
 0x311   :  { %v848_v11 = vpop.permute.xlu1 %847  ;;  %v1079_v31 = vpop.permute.xlu0 %1078 }
 0x312   :  { %v932_v33 = vpop.permute.xlu2 %931  ;;  %v865_v26 = vadd.f32 %v848_v11, %v824_v22  ;;  %v1083_v1 = vmul.f32 %v1685_v45, %v1079_v31  ;;  %v1082_v5 = vmul.f32 %v1679_v42, %v1079_v31  ;;  %v1081_v6 = vmul.f32 %v1675_v41, %v1079_v31 }
 0x313   :  { %v948_v30 = vadd.f32 %v932_v33, %v907_v17  ;;  %v1084_v40 = vmul.f32 %v1266_v37, %v1079_v31  ;;  %v1086_v56 = vmul.f32 %v1268_v55, %v1079_v31  ;;  %v1085_v21 = vmul.f32 %v1267_v16, %v1079_v31 }
 0x314   :  { %1097 = vrot.lane.b32.xlu0 %v1083_v1, %s1378_s16  ;;  %1095 = vrot.lane.b32.xlu2 %v1082_v5, %s1378_s16 }
 0x315   :  { %1093 = vrot.lane.b32.xlu1 %v1081_v6, %s1378_s16 }
 0x319   :  { %v854_v34 = vpop.permute.xlu1 %853  ;;  %v852_v36 = vpop.permute.xlu0 %851 }
 0x31a   :  { %v868_v60 = vadd.f32 %v854_v34, %v827_v29  ;;  %v867_v38 = vadd.f32 %v852_v36, %v826_v63  ;;  %v971_v48 = vpop.permute.xlu2 %970 }
 0x31c   :  { %1099 = vrot.lane.b32.xlu0 %v1084_v40, %s1378_s16  ;;  %1058 = vrot.lane.b32.xlu2 %v1043_v7, %s1377_s14 }
 0x31d   :  { %1019 = vrot.lane.b32.xlu1 %v1003_v3, %s1376_s13 }
 0x321   :  { %v889_v43 = vpop.permute.xlu1 %888  ;;  %v858_v35 = vpop.permute.xlu0 %857 }
 0x322   :  { %v906_v19 = vadd.f32 %v889_v43, %v865_v26  ;;  %v1767_v15 = vadd.f32 %v858_v35, %v829_v12  ;;  %v936_v58 = vpop.permute.xlu2 %935 }
 0x324   :  { %1062 = vrot.lane.b32.xlu0 %v1045_v32, %s1377_s14  ;;  %1060 = vrot.lane.b32.xlu2 %v1044_v46, %s1377_s14 }
 0x325   :  { %1021 = vrot.lane.b32.xlu1 %v1004_v47, %s1376_s13 }
 0x329   :  { %v930_v50 = vpop.permute.xlu1 %929  ;;  %v893_v51 = vpop.permute.xlu0 %892 }
 0x32a   :  { %v947_v53 = vadd.f32 %v930_v50, %v906_v19  ;;  %v908_v61 = vadd.f32 %v893_v51, %v867_v38  ;;  %v1014_v10 = vpop.permute.xlu2 %1013 }
 0x32c   :  { %1103 = vrot.lane.b32.xlu0 %v1086_v56, %s1378_s16  ;;  %1132 = vrot.lane.b32.xlu2 %v1679_v42, %s1330_s22  ;;  %v988_v2 = vadd.f32 %v971_v48, %v947_v53 }
 0x32d   :  { %1130 = vrot.lane.b32.xlu1 %v1675_v41, %s1330_s22 }
 0x331   :  { %v934_v25 = vpop.permute.xlu1 %933  ;;  %v895_v57 = vpop.permute.xlu0 %894 }
 0x332   :  { %v949_v18 = vadd.f32 %v934_v25, %v908_v61  ;;  %v909_v59 = vadd.f32 %v895_v57, %v868_v60  ;;  %v977_v39 = vpop.permute.xlu2 %976 }
 0x334   :  { %v1780_v62 = vadd.f32 %v936_v58, %v909_v59  ;;  %1140 = vrot.lane.b32.xlu0 %v1268_v55, %s1330_s22  ;;  %1134 = vrot.lane.b32.xlu2 %v1685_v45, %s1330_s22 }
 0x335   :  { %1101 = vrot.lane.b32.xlu1 %v1085_v21, %s1378_s16 }
 0x339   :  { %v897_v42 = vpop.permute.xlu1 %896  ;;  %v973_v4 = vpop.permute.xlu0 %972 }
 0x33a   :  { %v910_v63 = vadd.f32 %v897_v42, %v869_v24  ;;  %v989_v0 = vadd.f32 %v973_v4, %v948_v30  ;;  %v1055_v13 = vpop.permute.xlu2 %1054 }
 0x33c   :  { %1138 = vrot.lane.b32.xlu2 %v1267_v16, %s1330_s22  ;;  %v1030_v33 = vadd.f32 %v1014_v10, %v989_v0 }
 0x33d   :  { %1136 = vrot.lane.b32.xlu1 %v1266_v37, %s1330_s22 }
 0x33e   :  { %v1071_v6 = vadd.f32 %v1055_v13, %v1030_v33 }
 0x341   :  { %v975_v41 = vpop.permute.xlu0 %974  ;;  %v1012_v12 = vpop.permute.xlu1 %1011 }
 0x342   :  { %v990_v9 = vadd.f32 %v975_v41, %v949_v18  ;;  %v1018_v8 = vpop.permute.xlu2 %1017  ;;  %v1029_v1 = vadd.f32 %v1012_v12, %v988_v2  ;;  %v991_v2 = vadd.f32 %v977_v39, %v1780_v62 }
 0x344   :  { %v1032_v58 = vadd.f32 %v1018_v8, %v991_v2 }
 0x345   :  { %1173 = vrot.lane.b32.xlu1 %v1123_v49, %s1329_s0  ;;  %s1379_s0 = smov [#allocation5]  }
 0x346   :  { %s1190_s22 = sshll.u32 %s1379_s0, 4  ;;  %s1191_s22 = int_to_ptr.vmem [resolvable:$true] %s1190_s22 }
 0x349   :  { %v899_v54 = vpop.permute.xlu0 %898  ;;  %v938_v14 = vpop.permute.xlu1 %937 }
 0x34a   :  { %v951_v3 = vadd.f32 %v938_v14, %v910_v63  ;;  %v911_v32 = vadd.f32 %v899_v54, %v1767_v15 }
 0x351   :  { %v1016_v45 = vpop.permute.xlu0 %1015  ;;  %v1053_v22 = vpop.permute.xlu1 %1052 }
 0x352   :  { %v1031_v5 = vadd.f32 %v1016_v45, %v990_v9  ;;  %v1070_v34 = vadd.f32 %v1053_v22, %v1029_v1 }
 0x359   :  { %v940_v20 = vpop.permute.xlu0 %939  ;;  %v979_v27 = vpop.permute.xlu1 %978 }
 0x35a   :  { %v992_v46 = vadd.f32 %v979_v27, %v951_v3  ;;  %v952_v50 = vadd.f32 %v940_v20, %v911_v32 }
 0x361   :  { %v1057_v44 = vpop.permute.xlu0 %1056 }
 0x362   :  { %v1072_v36 = vadd.f32 %v1057_v44, %v1031_v5 }
 0x369   :  { %v981_v52 = vpop.permute.xlu0 %980 }
 0x36a   :  { %v993_v25 = vadd.f32 %v981_v52, %v952_v50 }
 0x36e   :  { %v1096_v23 = vpop.permute.xlu2 %1095 }
 0x36f   :  { %v1112_v60 = vadd.f32 %v1096_v23, %v1071_v6 }
 0x371   :  { %v1118_v7 = vmax.f32 %v1112_v60, 0.0 }
 0x376   :  { %v1059_v28 = vpop.permute.xlu2 %1058 }
 0x377   :  { %v1073_v4 = vadd.f32 %v1059_v28, %v1032_v58 }
 0x37e   :  { %v1061_v24 = vpop.permute.xlu2 %1060 }
 0x386   :  { %v1098_v17 = vpop.permute.xlu0 %1097  ;;  %v1133_v26 = vpop.permute.xlu2 %1132 }
 0x387   :  { %v1094_v29 = vpop.permute.xlu1 %1093  ;;  %v1113_v37 = vadd.f32 %v1098_v17, %v1072_v36  ;;  %v1149_v43 = vmul.f32 %v1133_v26, %v1118_v7 }
 0x388   :  { %v1111_v38 = vadd.f32 %v1094_v29, %v1070_v34 }
 0x389   :  { %v1119_v19 = vmax.f32 %v1113_v37, 0.0  ;;  %v1156_v51 = vsel %vm1154_vm0, %v1149_v43, 0.0 }
 0x38a   :  { %v1117_v35 = vmax.f32 %v1111_v38, 0.0 }
 0x38e   :  { %v1100_v31 = vpop.permute.xlu0 %1099  ;;  %v1135_v16 = vpop.permute.xlu2 %1134 }
 0x38f   :  { %v1020_v11 = vpop.permute.xlu1 %1019  ;;  %v1150_v47 = vmul.f32 %v1135_v16, %v1119_v19  ;;  %v1114_v0 = vadd.f32 %v1100_v31, %v1073_v4 }
 0x390   :  { %v1033_v53 = vadd.f32 %v1020_v11, %v992_v46 }
 0x391   :  { %v1158_v57 = vsel %vm1154_vm0, %v1150_v47, 0.0  ;;  %v1120_v54 = vmax.f32 %v1114_v0, 0.0 }
 0x392   :  { %v1074_v15 = vadd.f32 %v1061_v24, %v1033_v53 }
 0x396   :  { %v1063_v40 = vpop.permute.xlu0 %1062  ;;  %v1139_v10 = vpop.permute.xlu2 %1138 }
 0x397   :  { %v1022_v30 = vpop.permute.xlu1 %1021 }
 0x398   :  { %v1034_v21 = vadd.f32 %v1022_v30, %v993_v25 }
 0x39a   :  { %v1075_v41 = vadd.f32 %v1063_v40, %v1034_v21 }
 0x39e   :  { %v1104_v18 = vpop.permute.xlu0 %1103 }
 0x39f   :  { %v1131_v55 = vpop.permute.xlu1 %1130  ;;  %v1116_v9 = vadd.f32 %v1104_v18, %v1075_v41 }
 0x3a0   :  { %v1148_v48 = vmul.f32 %v1131_v55, %v1117_v35 }
 0x3a1   :  { %v1122_v62 = vmax.f32 %v1116_v9, 0.0 }
 0x3a2   :  { %v1155_v61 = vsel %vm1154_vm0, %v1148_v48, 0.0 }
 0x3a3   :  { %v1157_v56 = vadd.f32 %v1156_v51, %v1155_v61 }
 0x3a5   :  { %v1159_v59 = vadd.f32 %v1158_v57, %v1157_v56 }
 0x3a6   :  { %v1141_v12 = vpop.permute.xlu0 %1140 }
 0x3a7   :  { %v1102_v42 = vpop.permute.xlu1 %1101  ;;  %v1153_v14 = vmul.f32 %v1141_v12, %v1122_v62 }
 0x3a8   :  { %v1115_v63 = vadd.f32 %v1102_v42, %v1074_v15 }
 0x3a9   :  { %v1164_v23 = vsel %vm1154_vm0, %v1153_v14, 0.0 }
 0x3aa   :  { %v1121_v49 = vmax.f32 %v1115_v63, 0.0 }
 0x3ac   :  { %v1152_v39 = vmul.f32 %v1139_v10, %v1121_v49 }
 0x3ae   :  { %v1162_v22 = vsel %vm1154_vm0, %v1152_v39, 0.0 }
 0x3af   :  { %v1137_v45 = vpop.permute.xlu1 %1136 }
 0x3b0   :  { %v1151_v13 = vmul.f32 %v1137_v45, %v1120_v54 }
 0x3b2   :  { %v1160_v20 = vsel %vm1154_vm0, %v1151_v13, 0.0 }
 0x3b3   :  { %v1161_v8 = vadd.f32 %v1160_v20, %v1159_v59 }
 0x3b5   :  { %v1163_v44 = vadd.f32 %v1162_v22, %v1161_v8 }
 0x3b7   :  { %v1165_v27 = vadd.f32 %v1164_v23, %v1163_v44  ;;  %v1174_v11 = vpop.permute.xlu1 %1173 }
 0x3b9   :  { %v1166_v52 = vrot.slane %v1165_v27, 4 }
 0x3bb   :  { %v1167_v28 = vadd.f32 %v1166_v52, %v1165_v27 }
 0x3bd   :  { %v1168_v29 = vrot.slane %v1167_v28, 2 }
 0x3bf   :  { %v1169_v17 = vadd.f32 %v1168_v29, %v1167_v28 }
 0x3c1   :  { %v1170_v24 = vrot.slane %v1169_v17, 1 }
 0x3c3   :  { %v1171_v31 = vadd.f32 %v1170_v24, %v1169_v17 }
 0x3c5   :  { %v1176_v33 = vadd.f32 %v1174_v11, %v1171_v31 }
 0x3c7   :  { %1261 = vtanh.f32 %v1176_v33 }
 0x3cd   :  { %v1262_v26 = vpop.eup %1261 }
 0x3ce   :  { %v1178_v1 = vmul.f32 10.0, %v1262_v26 }
 0x3d0   :  { %1180 = vrot.lane.b32.xlu2 %v1178_v1, %s1338_s30 }
 0x42a   :  { %v1181_v5 = vpop.permute.xlu2 %1180 }
 0x42b   :  { %1184 = vst.msk [vmem:[#allocation5] sm:$0x1] %vm1183_vm1, %v1181_v5 }
 0x42c   :  { %1195 = dma.vmem_to_hbm [thread:$0]  %s1191_s22, 16, %s1193_s19, [#allocation4]  }
 0x42d   :  { %1319 = dma.done.wait [#allocation4], 16  }
 0x42e   :  { %1320 = vsyncadd [#allocation4], 4294967280 }
 0x42f   :  { %1200 = vsyncpa [#allocation3], 1 }
 0x430   :  { %1201 = vsyncpa [#allocation4], 1 }

</bundles_post_ra>
